<compile_context>
chip_gen: v6e
topology: v6e:2x2x1
jax: 0.10.0
libtpu: 0.0.40
codegen_flags: <defaults>
</compile_context>

<pallas_src>
import functools
from math import sqrt

import jax
import jax.numpy as jnp
from jax.experimental import pallas as pl
from jax.experimental.pallas import tpu as pltpu


def tupe_attention_kernel(q_ref, pq_ref, mask_ref, k_ref, pk_ref, v_ref,
                          wq2_ref, bq2_ref, wk2_ref, bk2_ref, wv_ref, bv_ref,
                          wo_ref, bo_ref,
                          out_ref, attn_ref,
                          kcat_scr, v_scr, *, n_heads, d_k, d_v):
    """One grid step == (one batch element, one tile of L query rows)."""
    f32 = jnp.float32
    bf16 = jnp.bfloat16
    H = n_heads

    def to_heads(x2d, d):
        # (T, H*d) -> (H, T, d) bf16
        T = x2d.shape[0]
        return jnp.transpose(x2d.reshape(T, H, d), (1, 0, 2)).astype(bf16)

    def cat_heads(x_c, x_p, d):
        # content (T, H*d) + positional (T, H*d) -> (H, T, 2d) bf16
        T = x_c.shape[0]
        cat = jnp.concatenate([x_c.reshape(T, H, d), x_p.reshape(T, H, d)],
                              axis=-1)
        return jnp.transpose(cat, (1, 0, 2)).astype(bf16)

    # ---- K-side projections: computed once per batch element (first query
    # tile) and cached in VMEM scratch across the L-tile ("arbitrary") axis.
    @pl.when(pl.program_id(1) == 0)
    def _():
        k = k_ref[0]          # (S, D) bf16
        pk = pk_ref[0]        # (S, D) bf16
        v = v_ref[0]          # (S, D) bf16
        Kx = jnp.dot(k, wk2_ref[0], preferred_element_type=f32) + bk2_ref[0]
        Kp = jnp.dot(pk, wk2_ref[1], preferred_element_type=f32) + bk2_ref[1]
        Vp = jnp.dot(v, wv_ref[...], preferred_element_type=f32) + bv_ref[...]
        kcat_scr[...] = cat_heads(Kx, Kp, d_k)        # (H, S, 2*d_k) bf16
        v_scr[...] = to_heads(Vp, d_v)                # (H, S, d_v)   bf16

    # ---- Q-side projections (per step).  1/sqrt(d_k) is already folded into
    # wq/wpq and bq/bpq in the wrapper.
    q = q_ref[0]              # (TL, D) bf16
    pq = pq_ref[0]            # (TL, D) bf16
    Qx = jnp.dot(q, wq2_ref[0], preferred_element_type=f32) + bq2_ref[0]
    Qp = jnp.dot(pq, wq2_ref[1], preferred_element_type=f32) + bq2_ref[1]
    Qcat = cat_heads(Qx, Qp, d_k)                     # (H, TL, 2*d_k) bf16

    # ---- fused TUPE scores: content-content + position-position in ONE
    # head-batched matmul (contraction depth 2*d_k).
    scores = jnp.einsum('hld,hsd->hls', Qcat, kcat_scr[...],
                        preferred_element_type=f32)   # (H, TL, S) f32
    scores = scores + mask_ref[0].astype(f32)[None, :, :]

    # Numerically stable softmax over S; exp / approx reciprocal use the EUP.
    m = jnp.max(scores, axis=-1, keepdims=True)
    e = jnp.exp(scores - m)
    a = e * pl.reciprocal(jnp.sum(e, axis=-1, keepdims=True), approx=True)

    attn_ref[0] = a.astype(attn_ref.dtype)            # (H, TL, S)

    # Weighted values, batched over heads, then a single in-vreg pack
    # (H, TL, d_v) -> (TL, H*d_v) feeding one wide output projection.
    ctx = jnp.einsum('hls,hsd->hld', a.astype(bf16), v_scr[...],
                     preferred_element_type=f32)       # (H, TL, d_v) f32
    TL = q.shape[0]
    ctx_packed = jnp.transpose(ctx.astype(bf16), (1, 0, 2)).reshape(TL, H * d_v)
    out_ref[0] = (jnp.dot(ctx_packed, wo_ref[...], preferred_element_type=f32)
                  + bo_ref[...])


def _pick_tile(L, l_tile):
    """Largest multiple of 16 that divides L and is <= l_tile."""
    for t in range(min(l_tile, L), 15, -1):
        if t % 16 == 0 and L % t == 0:
            return t
    # TODO(synk): pad L instead of falling back to a full-length tile.
    return L


def tupe_attention_layer(queries, keys, values, attn_mask,
                         pos_queries, pos_keys, params, n_heads,
                         l_tile=256, attn_dtype=jnp.bfloat16):
    B, L, D = queries.shape
    _, S, _ = keys.shape
    HDk = params["wq"].shape[1]
    HDv = params["wv"].shape[1]
    d_k = HDk // n_heads
    d_v = HDv // n_heads

    TL = _pick_tile(L, l_tile)
    n_l = L // TL

    f32, bf16 = jnp.float32, jnp.bfloat16
    scale = 1.0 / sqrt(d_k)

    # Pack Q-side (scaled) and K-side projection weights into stacked inputs
    # (fewer DMA descriptors); V stays separate so d_keys != d_values is fine.
    wq2 = jnp.stack([params["wq"] * scale, params["wpq"] * scale]).astype(bf16)
    bq2 = jnp.stack([params["bq"] * scale, params["bpq"] * scale]).astype(f32)
    wk2 = jnp.stack([params["wk"], params["wpk"]]).astype(bf16)
    bk2 = jnp.stack([params["bk"], params["bpk"]]).astype(f32)
    wv = params["wv"].astype(bf16)
    bv = params["bv"].astype(f32)
    wo = params["wo"].astype(bf16)
    bo = params["bo"].astype(f32)

    q_b = queries.astype(bf16)
    pq_b = pos_queries.astype(bf16)
    k_b = keys.astype(bf16)
    pk_b = pos_keys.astype(bf16)
    v_b = values.astype(bf16)
    mask_b = attn_mask.astype(bf16)

    # Generation-aware VMEM budget (v6e: 128 MiB -> ~96 MiB, v7x: 64 -> ~48).
    try:
        vmem_cap = pltpu.get_tpu_info().vmem_capacity_bytes
    except Exception:
        vmem_cap = 64 * 1024 * 1024
    vmem_limit = int(vmem_cap * 0.75)

    kernel = functools.partial(tupe_attention_kernel,
                               n_heads=n_heads, d_k=d_k, d_v=d_v)

    in_specs = [
        pl.BlockSpec((1, TL, D), lambda b, l: (b, l, 0)),      # queries
        pl.BlockSpec((1, TL, D), lambda b, l: (b, l, 0)),      # pos_queries
        pl.BlockSpec((1, TL, S), lambda b, l: (b, l, 0)),      # attn_mask (bf16)
        pl.BlockSpec((1, S, D), lambda b, l: (b, 0, 0)),       # keys
        pl.BlockSpec((1, S, D), lambda b, l: (b, 0, 0)),       # pos_keys
        pl.BlockSpec((1, S, D), lambda b, l: (b, 0, 0)),       # values
        pl.BlockSpec((2, D, HDk), lambda b, l: (0, 0, 0)),     # wq | wpq (scaled)
        pl.BlockSpec((2, 1, HDk), lambda b, l: (0, 0, 0)),     # bq | bpq (scaled)
        pl.BlockSpec((2, D, HDk), lambda b, l: (0, 0, 0)),     # wk | wpk
        pl.BlockSpec((2, 1, HDk), lambda b, l: (0, 0, 0)),     # bk | bpk
        pl.BlockSpec((D, HDv), lambda b, l: (0, 0)),           # wv
        pl.BlockSpec((1, HDv), lambda b, l: (0, 0)),           # bv
        pl.BlockSpec((HDv, D), lambda b, l: (0, 0)),           # wo
        pl.BlockSpec((1, D), lambda b, l: (0, 0)),             # bo
    ]
    out_specs = (
        pl.BlockSpec((1, TL, D), lambda b, l: (b, l, 0)),
        pl.BlockSpec((1, n_heads, TL, S), lambda b, l: (b, 0, l, 0)),
    )
    out_shape = (
        jax.ShapeDtypeStruct((B, L, D), f32),
        jax.ShapeDtypeStruct((B, n_heads, L, S), attn_dtype),
    )

    return pl.pallas_call(
        kernel,
        grid=(B, n_l),
        in_specs=in_specs,
        out_specs=out_specs,
        out_shape=out_shape,
        scratch_shapes=[
            pltpu.VMEM((n_heads, S, 2 * d_k), bf16),   # cached [Kx | Kp] heads
            pltpu.VMEM((n_heads, S, d_v), bf16),       # cached V heads
        ],
        compiler_params=pltpu.CompilerParams(
            # B parallel (megacore shards batches); L must stay "arbitrary"
            # because the K-side scratch is carried across query tiles.
            dimension_semantics=("parallel", "arbitrary"),
            vmem_limit_bytes=vmem_limit),
    )(q_b, pq_b, mask_b, k_b, pk_b, v_b,
      wq2, bq2, wk2, bk2, wv, bv, wo, bo)


def reference(queries, keys, values, attn_mask, pos_queries, pos_keys, params, n_heads):
    """Pure-JAX (f32) reference mirroring the PyTorch forward (mix=False)."""
    B, L, D = queries.shape
    _, S, _ = keys.shape
    d_k = params["wq"].shape[1] // n_heads
    d_v = params["wv"].shape[1] // n_heads

    def proj(x, w, b):
        return x @ w + b[0]

    Qx = proj(queries, params["wq"], params["bq"]).reshape(B, L, n_heads, d_k)
    Kx = proj(keys, params["wk"], params["bk"]).reshape(B, S, n_heads, d_k)
    V = proj(values, params["wv"], params["bv"]).reshape(B, S, n_heads, d_v)
    Qp = proj(pos_queries, params["wpq"], params["bpq"]).reshape(B, L, n_heads, d_k)
    Kp = proj(pos_keys, params["wpk"], params["bpk"]).reshape(B, S, n_heads, d_k)

    scale = 1.0 / sqrt(d_k)
    scores = (jnp.einsum("blhe,bshe->bhls", Qx, Kx)
              + jnp.einsum("blhe,bshe->bhls", Qp, Kp)) * scale
    scores = scores + attn_mask[:, None, :, :]
    attn = jax.nn.softmax(scores, axis=-1)
    out = jnp.einsum("bhls,bshd->blhd", attn, V).reshape(B, L, n_heads * d_v)
    out = out @ params["wo"] + params["bo"][0]
    return out, attn


if __name__ == "__main__":
    B, L, S, d_model, n_heads = 2, 32, 16, 32, 4
    d_k = d_model // n_heads
    d_v = d_model // n_heads

    key = jax.random.PRNGKey(0)
    ks = jax.random.split(key, 20)

    def init_linear(kw, kb, d_in, d_out):
        bound = 1.0 / sqrt(d_in)
        w = jax.random.uniform(kw, (d_in, d_out), jnp.float32, -bound, bound)
        b = jax.random.uniform(kb, (1, d_out), jnp.float32, -bound, bound)
        return w, b

    params = {}
    params["wq"], params["bq"] = init_linear(ks[0], ks[1], d_model, d_k * n_heads)
    params["wk"], params["bk"] = init_linear(ks[2], ks[3], d_model, d_k * n_heads)
    params["wv"], params["bv"] = init_linear(ks[4], ks[5], d_model, d_v * n_heads)
    params["wpq"], params["bpq"] = init_linear(ks[6], ks[7], d_model, d_k * n_heads)
    params["wpk"], params["bpk"] = init_linear(ks[8], ks[9], d_model, d_k * n_heads)
    params["wo"], params["bo"] = init_linear(ks[10], ks[11], d_v * n_heads, d_model)

    queries = jax.random.normal(ks[12], (B, L, d_model), jnp.float32)
    keys = jax.random.normal(ks[13], (B, S, d_model), jnp.float32)
    values = jax.random.normal(ks[14], (B, S, d_model), jnp.float32)
    pos_queries = jax.random.normal(ks[15], (B, L, d_model), jnp.float32)
    pos_keys = jax.random.normal(ks[16], (B, S, d_model), jnp.float32)
    # additive float mask (zeros == no masking); use mildly non-trivial values
    attn_mask = -jnp.abs(jax.random.normal(ks[17], (B, L, S), jnp.float32))

    # l_tile=16 -> two query tiles per batch element, exercising the cached
    # K-side scratch / pl.when path.
    out, attn = tupe_attention_layer(queries, keys, values, attn_mask,
                                     pos_queries, pos_keys, params, n_heads,
                                     l_tile=16)
    jax.block_until_ready((out, attn))

    out_ref, attn_expected = reference(queries, keys, values, attn_mask,
                                       pos_queries, pos_keys, params, n_heads)
    assert out.shape == (B, L, d_model) and attn.shape == (B, n_heads, L, S)
    # bf16 matmul inputs / bf16 mask + attn storage with f32 accumulation ->
    # looser tolerances than pure f32.
    assert jnp.allclose(out, out_ref, atol=5e-2, rtol=5e-2), \
        float(jnp.max(jnp.abs(out - out_ref)))
    assert jnp.allclose(attn.astype(jnp.float32), attn_expected,
                        atol=2e-2, rtol=2e-2), \
        float(jnp.max(jnp.abs(attn.astype(jnp.float32) - attn_expected)))

    print("KERNEL_OK")
</pallas_src>

<mosaic_0001>
module attributes {stable_mosaic.version = 11 : i64} {
  func.func @tupe_attention_kernel(%arg0: i32, %arg1: i32, %arg2: memref<1x16x32xbf16, #tpu.memory_space<vmem>>, %arg3: memref<1x16x32xbf16, #tpu.memory_space<vmem>>, %arg4: memref<1x16x16xbf16, #tpu.memory_space<vmem>>, %arg5: memref<1x16x32xbf16, #tpu.memory_space<vmem>>, %arg6: memref<1x16x32xbf16, #tpu.memory_space<vmem>>, %arg7: memref<1x16x32xbf16, #tpu.memory_space<vmem>>, %arg8: memref<2x32x32xbf16, #tpu.memory_space<vmem>>, %arg9: memref<2x1x32xf32, #tpu.memory_space<vmem>>, %arg10: memref<2x32x32xbf16, #tpu.memory_space<vmem>>, %arg11: memref<2x1x32xf32, #tpu.memory_space<vmem>>, %arg12: memref<32x32xbf16, #tpu.memory_space<vmem>>, %arg13: memref<1x32xf32, #tpu.memory_space<vmem>>, %arg14: memref<32x32xbf16, #tpu.memory_space<vmem>>, %arg15: memref<1x32xf32, #tpu.memory_space<vmem>>, %arg16: memref<1x16x32xf32, #tpu.memory_space<vmem>>, %arg17: memref<1x4x16x16xbf16, #tpu.memory_space<vmem>>, %arg18: memref<4x16x16xbf16, #tpu.memory_space<vmem>>, %arg19: memref<4x16x8xbf16, #tpu.memory_space<vmem>>) attributes {dimension_semantics = [#tpu.dimension_semantics<parallel>, #tpu.dimension_semantics<arbitrary>], iteration_bounds = array<i64: 2, 2>, scalar_prefetch = 0 : i64, scratch_operands = 2 : i64, tpu.core_type = #tpu.core_type<tc>, window_params = [{transform_indices = @transform_0, window_bounds = array<i64: 1, 16, 32>}, {transform_indices = @transform_1, window_bounds = array<i64: 1, 16, 32>}, {transform_indices = @transform_2, window_bounds = array<i64: 1, 16, 16>}, {transform_indices = @transform_3, window_bounds = array<i64: 1, 16, 32>}, {transform_indices = @transform_4, window_bounds = array<i64: 1, 16, 32>}, {transform_indices = @transform_5, window_bounds = array<i64: 1, 16, 32>}, {pipeline_mode = #tpu.pipeline_mode<synchronous>, transform_indices = @transform_6, window_bounds = array<i64: 2, 32, 32>}, {pipeline_mode = #tpu.pipeline_mode<synchronous>, transform_indices = @transform_7, window_bounds = array<i64: 2, 1, 32>}, {pipeline_mode = #tpu.pipeline_mode<synchronous>, transform_indices = @transform_8, window_bounds = array<i64: 2, 32, 32>}, {pipeline_mode = #tpu.pipeline_mode<synchronous>, transform_indices = @transform_9, window_bounds = array<i64: 2, 1, 32>}, {pipeline_mode = #tpu.pipeline_mode<synchronous>, transform_indices = @transform_10, window_bounds = array<i64: 32, 32>}, {pipeline_mode = #tpu.pipeline_mode<synchronous>, transform_indices = @transform_11, window_bounds = array<i64: 1, 32>}, {pipeline_mode = #tpu.pipeline_mode<synchronous>, transform_indices = @transform_12, window_bounds = array<i64: 32, 32>}, {pipeline_mode = #tpu.pipeline_mode<synchronous>, transform_indices = @transform_13, window_bounds = array<i64: 1, 32>}, {transform_indices = @transform_14, window_bounds = array<i64: 1, 16, 32>}, {transform_indices = @transform_15, window_bounds = array<i64: 1, 4, 16, 16>}]} {
    %c0_i32 = arith.constant 0 : i32
    %0 = arith.cmpi eq, %arg1, %c0_i32 : i32
    %1 = arith.extui %0 : i1 to i32
    %c0_i32_0 = arith.constant 0 : i32
    %2 = arith.cmpi ne, %1, %c0_i32_0 : i32
    scf.if %2 {
      %c0_43 = arith.constant 0 : index
      %c0_44 = arith.constant 0 : index
      %c0_45 = arith.constant 0 : index
      %62 = vector.load %arg5[%c0_43, %c0_44, %c0_45] : memref<1x16x32xbf16, #tpu.memory_space<vmem>>, vector<1x16x32xbf16>
      %63 = vector.shape_cast %62 : vector<1x16x32xbf16> to vector<16x32xbf16>
      %c0_46 = arith.constant 0 : index
      %c0_47 = arith.constant 0 : index
      %c0_48 = arith.constant 0 : index
      %64 = vector.load %arg6[%c0_46, %c0_47, %c0_48] : memref<1x16x32xbf16, #tpu.memory_space<vmem>>, vector<1x16x32xbf16>
      %65 = vector.shape_cast %64 : vector<1x16x32xbf16> to vector<16x32xbf16>
      %c0_49 = arith.constant 0 : index
      %c0_50 = arith.constant 0 : index
      %c0_51 = arith.constant 0 : index
      %66 = vector.load %arg7[%c0_49, %c0_50, %c0_51] : memref<1x16x32xbf16, #tpu.memory_space<vmem>>, vector<1x16x32xbf16>
      %67 = vector.shape_cast %66 : vector<1x16x32xbf16> to vector<16x32xbf16>
      %c0_52 = arith.constant 0 : index
      %c0_53 = arith.constant 0 : index
      %c0_54 = arith.constant 0 : index
      %68 = vector.load %arg10[%c0_52, %c0_53, %c0_54] : memref<2x32x32xbf16, #tpu.memory_space<vmem>>, vector<1x32x32xbf16>
      %69 = vector.shape_cast %68 : vector<1x32x32xbf16> to vector<32x32xbf16>
      %cst_55 = arith.constant dense<0.000000e+00> : vector<16x32xf32>
      %70 = tpu.matmul %63, %69, %cst_55 {dimension_numbers = #tpu.dot_dimension_numbers<[1], [0], [0], [1], [0, 0, 1, 1], [], []>} : vector<16x32xbf16>, vector<32x32xbf16>, vector<16x32xf32> -> vector<16x32xf32>
      %c0_56 = arith.constant 0 : index
      %c0_57 = arith.constant 0 : index
      %c0_58 = arith.constant 0 : index
      %71 = vector.load %arg11[%c0_56, %c0_57, %c0_58] : memref<2x1x32xf32, #tpu.memory_space<vmem>>, vector<1x1x32xf32>
      %72 = vector.shape_cast %71 : vector<1x1x32xf32> to vector<1x32xf32>
      %73 = vector.broadcast %72 : vector<1x32xf32> to vector<16x32xf32>
      %74 = arith.addf %70, %73 : vector<16x32xf32>
      %c1_59 = arith.constant 1 : index
      %c0_60 = arith.constant 0 : index
      %c0_61 = arith.constant 0 : index
      %75 = vector.load %arg10[%c1_59, %c0_60, %c0_61] : memref<2x32x32xbf16, #tpu.memory_space<vmem>>, vector<1x32x32xbf16>
      %76 = vector.shape_cast %75 : vector<1x32x32xbf16> to vector<32x32xbf16>
      %cst_62 = arith.constant dense<0.000000e+00> : vector<16x32xf32>
      %77 = tpu.matmul %65, %76, %cst_62 {dimension_numbers = #tpu.dot_dimension_numbers<[1], [0], [0], [1], [0, 0, 1, 1], [], []>} : vector<16x32xbf16>, vector<32x32xbf16>, vector<16x32xf32> -> vector<16x32xf32>
      %c1_63 = arith.constant 1 : index
      %c0_64 = arith.constant 0 : index
      %c0_65 = arith.constant 0 : index
      %78 = vector.load %arg11[%c1_63, %c0_64, %c0_65] : memref<2x1x32xf32, #tpu.memory_space<vmem>>, vector<1x1x32xf32>
      %79 = vector.shape_cast %78 : vector<1x1x32xf32> to vector<1x32xf32>
      %80 = vector.broadcast %79 : vector<1x32xf32> to vector<16x32xf32>
      %81 = arith.addf %77, %80 : vector<16x32xf32>
      %c0_66 = arith.constant 0 : index
      %c0_67 = arith.constant 0 : index
      %82 = vector.load %arg12[%c0_66, %c0_67] : memref<32x32xbf16, #tpu.memory_space<vmem>>, vector<32x32xbf16>
      %cst_68 = arith.constant dense<0.000000e+00> : vector<16x32xf32>
      %83 = tpu.matmul %67, %82, %cst_68 {dimension_numbers = #tpu.dot_dimension_numbers<[1], [0], [0], [1], [0, 0, 1, 1], [], []>} : vector<16x32xbf16>, vector<32x32xbf16>, vector<16x32xf32> -> vector<16x32xf32>
      %c0_69 = arith.constant 0 : index
      %c0_70 = arith.constant 0 : index
      %84 = vector.load %arg13[%c0_69, %c0_70] : memref<1x32xf32, #tpu.memory_space<vmem>>, vector<1x32xf32>
      %85 = vector.broadcast %84 : vector<1x32xf32> to vector<16x32xf32>
      %86 = arith.addf %83, %85 : vector<16x32xf32>
      %87 = vector.shape_cast %74 : vector<16x32xf32> to vector<16x4x8xf32>
      %88 = vector.shape_cast %81 : vector<16x32xf32> to vector<16x4x8xf32>
      %89 = tpu.concatenate %87, %88 in 2 : vector<16x4x8xf32>, vector<16x4x8xf32> -> vector<16x4x16xf32>
      %90 = tpu.transpose %89, [1, 0, 2] : vector<16x4x16xf32> -> vector<4x16x16xf32>
      %91 = arith.truncf %90 : vector<4x16x16xf32> to vector<4x16x16xbf16>
      %c0_71 = arith.constant 0 : index
      %c0_72 = arith.constant 0 : index
      %c0_73 = arith.constant 0 : index
      %92 = vector.load %arg18[%c0_71, %c0_72, %c0_73] : memref<4x16x16xbf16, #tpu.memory_space<vmem>>, vector<4x16x16xbf16>
      tpu.vector_store %arg18[%c0_71, %c0_72, %c0_73], %91 {strides = array<i32>} : memref<4x16x16xbf16, #tpu.memory_space<vmem>>, vector<4x16x16xbf16>,
      %93 = vector.shape_cast %86 : vector<16x32xf32> to vector<16x4x8xf32>
      %94 = tpu.transpose %93, [1, 0, 2] : vector<16x4x8xf32> -> vector<4x16x8xf32>
      %95 = arith.truncf %94 : vector<4x16x8xf32> to vector<4x16x8xbf16>
      %c0_74 = arith.constant 0 : index
      %c0_75 = arith.constant 0 : index
      %c0_76 = arith.constant 0 : index
      %96 = vector.load %arg19[%c0_74, %c0_75, %c0_76] : memref<4x16x8xbf16, #tpu.memory_space<vmem>>, vector<4x16x8xbf16>
      tpu.vector_store %arg19[%c0_74, %c0_75, %c0_76], %95 {strides = array<i32>} : memref<4x16x8xbf16, #tpu.memory_space<vmem>>, vector<4x16x8xbf16>,
    } else {
    }
    %c0 = arith.constant 0 : index
    %c0_1 = arith.constant 0 : index
    %c0_2 = arith.constant 0 : index
    %3 = vector.load %arg2[%c0, %c0_1, %c0_2] : memref<1x16x32xbf16, #tpu.memory_space<vmem>>, vector<1x16x32xbf16>
    %4 = vector.shape_cast %3 : vector<1x16x32xbf16> to vector<16x32xbf16>
    %c0_3 = arith.constant 0 : index
    %c0_4 = arith.constant 0 : index
    %c0_5 = arith.constant 0 : index
    %5 = vector.load %arg3[%c0_3, %c0_4, %c0_5] : memref<1x16x32xbf16, #tpu.memory_space<vmem>>, vector<1x16x32xbf16>
    %6 = vector.shape_cast %5 : vector<1x16x32xbf16> to vector<16x32xbf16>
    %c0_6 = arith.constant 0 : index
    %c0_7 = arith.constant 0 : index
    %c0_8 = arith.constant 0 : index
    %7 = vector.load %arg8[%c0_6, %c0_7, %c0_8] : memref<2x32x32xbf16, #tpu.memory_space<vmem>>, vector<1x32x32xbf16>
    %8 = vector.shape_cast %7 : vector<1x32x32xbf16> to vector<32x32xbf16>
    %cst = arith.constant dense<0.000000e+00> : vector<16x32xf32>
    %9 = tpu.matmul %4, %8, %cst {dimension_numbers = #tpu.dot_dimension_numbers<[1], [0], [0], [1], [0, 0, 1, 1], [], []>} : vector<16x32xbf16>, vector<32x32xbf16>, vector<16x32xf32> -> vector<16x32xf32>
    %c0_9 = arith.constant 0 : index
    %c0_10 = arith.constant 0 : index
    %c0_11 = arith.constant 0 : index
    %10 = vector.load %arg9[%c0_9, %c0_10, %c0_11] : memref<2x1x32xf32, #tpu.memory_space<vmem>>, vector<1x1x32xf32>
    %11 = vector.shape_cast %10 : vector<1x1x32xf32> to vector<1x32xf32>
    %12 = vector.broadcast %11 : vector<1x32xf32> to vector<16x32xf32>
    %13 = arith.addf %9, %12 : vector<16x32xf32>
    %c1 = arith.constant 1 : index
    %c0_12 = arith.constant 0 : index
    %c0_13 = arith.constant 0 : index
    %14 = vector.load %arg8[%c1, %c0_12, %c0_13] : memref<2x32x32xbf16, #tpu.memory_space<vmem>>, vector<1x32x32xbf16>
    %15 = vector.shape_cast %14 : vector<1x32x32xbf16> to vector<32x32xbf16>
    %cst_14 = arith.constant dense<0.000000e+00> : vector<16x32xf32>
    %16 = tpu.matmul %6, %15, %cst_14 {dimension_numbers = #tpu.dot_dimension_numbers<[1], [0], [0], [1], [0, 0, 1, 1], [], []>} : vector<16x32xbf16>, vector<32x32xbf16>, vector<16x32xf32> -> vector<16x32xf32>
    %c1_15 = arith.constant 1 : index
    %c0_16 = arith.constant 0 : index
    %c0_17 = arith.constant 0 : index
    %17 = vector.load %arg9[%c1_15, %c0_16, %c0_17] : memref<2x1x32xf32, #tpu.memory_space<vmem>>, vector<1x1x32xf32>
    %18 = vector.shape_cast %17 : vector<1x1x32xf32> to vector<1x32xf32>
    %19 = vector.broadcast %18 : vector<1x32xf32> to vector<16x32xf32>
    %20 = arith.addf %16, %19 : vector<16x32xf32>
    %21 = vector.shape_cast %13 : vector<16x32xf32> to vector<16x4x8xf32>
    %22 = vector.shape_cast %20 : vector<16x32xf32> to vector<16x4x8xf32>
    %23 = tpu.concatenate %21, %22 in 2 : vector<16x4x8xf32>, vector<16x4x8xf32> -> vector<16x4x16xf32>
    %24 = tpu.transpose %23, [1, 0, 2] : vector<16x4x16xf32> -> vector<4x16x16xf32>
    %25 = arith.truncf %24 : vector<4x16x16xf32> to vector<4x16x16xbf16>
    %c0_18 = arith.constant 0 : index
    %c0_19 = arith.constant 0 : index
    %c0_20 = arith.constant 0 : index
    %26 = vector.load %arg18[%c0_18, %c0_19, %c0_20] : memref<4x16x16xbf16, #tpu.memory_space<vmem>>, vector<4x16x16xbf16>
    "tpu.trace_start"() <{level = 10 : i32, message = "hld,hsd->hls"}> : () -> ()
    %cst_21 = arith.constant dense<0.000000e+00> : vector<4x16x16xf32>
    %27 = tpu.matmul %25, %26, %cst_21 {dimension_numbers = #tpu.dot_dimension_numbers<[2], [2], [1], [1], [0, 0, 0, 1, 1, 1], [0], [0]>} : vector<4x16x16xbf16>, vector<4x16x16xbf16>, vector<4x16x16xf32> -> vector<4x16x16xf32>
    "tpu.trace_stop"() : () -> ()
    %c0_22 = arith.constant 0 : index
    %c0_23 = arith.constant 0 : index
    %c0_24 = arith.constant 0 : index
    %28 = vector.load %arg4[%c0_22, %c0_23, %c0_24] : memref<1x16x16xbf16, #tpu.memory_space<vmem>>, vector<1x16x16xbf16>
    %29 = vector.shape_cast %28 : vector<1x16x16xbf16> to vector<16x16xbf16>
    %30 = arith.extf %29 : vector<16x16xbf16> to vector<16x16xf32>
    %31 = vector.shape_cast %30 : vector<16x16xf32> to vector<1x16x16xf32>
    %32 = vector.broadcast %31 : vector<1x16x16xf32> to vector<4x16x16xf32>
    %33 = arith.addf %27, %32 : vector<4x16x16xf32>
    %cst_25 = arith.constant dense<0xFF800000> : vector<4x16xf32>
    %34 = vector.multi_reduction <maximumf>, %33, %cst_25 [2] : vector<4x16x16xf32> to vector<4x16xf32>
    %35 = vector.shape_cast %34 : vector<4x16xf32> to vector<4x16x1xf32>
    %36 = vector.broadcast %35 : vector<4x16x1xf32> to vector<4x16x16xf32>
    %37 = arith.subf %33, %36 : vector<4x16x16xf32>
    %38 = math.exp %37 : vector<4x16x16xf32>
    %cst_26 = arith.constant dense<0.000000e+00> : vector<4x16xf32>
    %39 = vector.multi_reduction <add>, %38, %cst_26 [2] : vector<4x16x16xf32> to vector<4x16xf32>
    %40 = vector.shape_cast %39 : vector<4x16xf32> to vector<4x16x1xf32>
    %41 = tpu.reciprocal %40 {approx = true} : vector<4x16x1xf32> -> vector<4x16x1xf32>
    %42 = vector.broadcast %41 : vector<4x16x1xf32> to vector<4x16x16xf32>
    %43 = arith.mulf %38, %42 : vector<4x16x16xf32>
    %44 = arith.truncf %43 : vector<4x16x16xf32> to vector<4x16x16xbf16>
    %c0_27 = arith.constant 0 : index
    %c0_28 = arith.constant 0 : index
    %c0_29 = arith.constant 0 : index
    %c0_30 = arith.constant 0 : index
    %45 = vector.load %arg17[%c0_27, %c0_28, %c0_29, %c0_30] : memref<1x4x16x16xbf16, #tpu.memory_space<vmem>>, vector<1x4x16x16xbf16>
    %46 = vector.shape_cast %45 : vector<1x4x16x16xbf16> to vector<4x16x16xbf16>
    %47 = vector.shape_cast %44 : vector<4x16x16xbf16> to vector<1x4x16x16xbf16>
    tpu.vector_store %arg17[%c0_27, %c0_28, %c0_29, %c0_30], %47 {strides = array<i32>} : memref<1x4x16x16xbf16, #tpu.memory_space<vmem>>, vector<1x4x16x16xbf16>,
    %48 = arith.truncf %43 : vector<4x16x16xf32> to vector<4x16x16xbf16>
    %c0_31 = arith.constant 0 : index
    %c0_32 = arith.constant 0 : index
    %c0_33 = arith.constant 0 : index
    %49 = vector.load %arg19[%c0_31, %c0_32, %c0_33] : memref<4x16x8xbf16, #tpu.memory_space<vmem>>, vector<4x16x8xbf16>
    "tpu.trace_start"() <{level = 10 : i32, message = "hls,hsd->hld"}> : () -> ()
    %cst_34 = arith.constant dense<0.000000e+00> : vector<4x16x8xf32>
    %50 = tpu.matmul %48, %49, %cst_34 {dimension_numbers = #tpu.dot_dimension_numbers<[2], [1], [1], [2], [0, 0, 0, 1, 1, 2], [0], [0]>} : vector<4x16x16xbf16>, vector<4x16x8xbf16>, vector<4x16x8xf32> -> vector<4x16x8xf32>
    "tpu.trace_stop"() : () -> ()
    %51 = arith.truncf %50 : vector<4x16x8xf32> to vector<4x16x8xbf16>
    %52 = tpu.transpose %51, [1, 0, 2] : vector<4x16x8xbf16> -> vector<16x4x8xbf16>
    %53 = vector.shape_cast %52 : vector<16x4x8xbf16> to vector<16x32xbf16>
    %c0_35 = arith.constant 0 : index
    %c0_36 = arith.constant 0 : index
    %54 = vector.load %arg14[%c0_35, %c0_36] : memref<32x32xbf16, #tpu.memory_space<vmem>>, vector<32x32xbf16>
    %cst_37 = arith.constant dense<0.000000e+00> : vector<16x32xf32>
    %55 = tpu.matmul %53, %54, %cst_37 {dimension_numbers = #tpu.dot_dimension_numbers<[1], [0], [0], [1], [0, 0, 1, 1], [], []>} : vector<16x32xbf16>, vector<32x32xbf16>, vector<16x32xf32> -> vector<16x32xf32>
    %c0_38 = arith.constant 0 : index
    %c0_39 = arith.constant 0 : index
    %56 = vector.load %arg15[%c0_38, %c0_39] : memref<1x32xf32, #tpu.memory_space<vmem>>, vector<1x32xf32>
    %57 = vector.broadcast %56 : vector<1x32xf32> to vector<16x32xf32>
    %58 = arith.addf %55, %57 : vector<16x32xf32>
    %c0_40 = arith.constant 0 : index
    %c0_41 = arith.constant 0 : index
    %c0_42 = arith.constant 0 : index
    %59 = vector.load %arg16[%c0_40, %c0_41, %c0_42] : memref<1x16x32xf32, #tpu.memory_space<vmem>>, vector<1x16x32xf32>
    %60 = vector.shape_cast %59 : vector<1x16x32xf32> to vector<16x32xf32>
    %61 = vector.shape_cast %58 : vector<16x32xf32> to vector<1x16x32xf32>
    tpu.vector_store %arg16[%c0_40, %c0_41, %c0_42], %61 {strides = array<i32>} : memref<1x16x32xf32, #tpu.memory_space<vmem>>, vector<1x16x32xf32>,
    return
  }
  func.func @transform_0(%arg0: i32, %arg1: i32) -> (i32, i32, i32) {
    %c0_i32 = arith.constant 0 : i32
    %c0_i32_0 = arith.constant 0 : i32
    return %arg0, %arg1, %c0_i32 : i32, i32, i32
  }
  func.func @transform_1(%arg0: i32, %arg1: i32) -> (i32, i32, i32) {
    %c0_i32 = arith.constant 0 : i32
    %c0_i32_0 = arith.constant 0 : i32
    return %arg0, %arg1, %c0_i32 : i32, i32, i32
  }
  func.func @transform_2(%arg0: i32, %arg1: i32) -> (i32, i32, i32) {
    %c0_i32 = arith.constant 0 : i32
    %c0_i32_0 = arith.constant 0 : i32
    return %arg0, %arg1, %c0_i32 : i32, i32, i32
  }
  func.func @transform_3(%arg0: i32, %arg1: i32) -> (i32, i32, i32) {
    %c0_i32 = arith.constant 0 : i32
    %c0_i32_0 = arith.constant 0 : i32
    %c0_i32_1 = arith.constant 0 : i32
    return %arg0, %c0_i32, %c0_i32_0 : i32, i32, i32
  }
  func.func @transform_4(%arg0: i32, %arg1: i32) -> (i32, i32, i32) {
    %c0_i32 = arith.constant 0 : i32
    %c0_i32_0 = arith.constant 0 : i32
    %c0_i32_1 = arith.constant 0 : i32
    return %arg0, %c0_i32, %c0_i32_0 : i32, i32, i32
  }
  func.func @transform_5(%arg0: i32, %arg1: i32) -> (i32, i32, i32) {
    %c0_i32 = arith.constant 0 : i32
    %c0_i32_0 = arith.constant 0 : i32
    %c0_i32_1 = arith.constant 0 : i32
    return %arg0, %c0_i32, %c0_i32_0 : i32, i32, i32
  }
  func.func @transform_6(%arg0: i32, %arg1: i32) -> (i32, i32, i32) {
    %c0_i32 = arith.constant 0 : i32
    %c0_i32_0 = arith.constant 0 : i32
    %c0_i32_1 = arith.constant 0 : i32
    %c0_i32_2 = arith.constant 0 : i32
    return %c0_i32, %c0_i32_0, %c0_i32_1 : i32, i32, i32
  }
  func.func @transform_7(%arg0: i32, %arg1: i32) -> (i32, i32, i32) {
    %c0_i32 = arith.constant 0 : i32
    %c0_i32_0 = arith.constant 0 : i32
    %c0_i32_1 = arith.constant 0 : i32
    %c0_i32_2 = arith.constant 0 : i32
    return %c0_i32, %c0_i32_0, %c0_i32_1 : i32, i32, i32
  }
  func.func @transform_8(%arg0: i32, %arg1: i32) -> (i32, i32, i32) {
    %c0_i32 = arith.constant 0 : i32
    %c0_i32_0 = arith.constant 0 : i32
    %c0_i32_1 = arith.constant 0 : i32
    %c0_i32_2 = arith.constant 0 : i32
    return %c0_i32, %c0_i32_0, %c0_i32_1 : i32, i32, i32
  }
  func.func @transform_9(%arg0: i32, %arg1: i32) -> (i32, i32, i32) {
    %c0_i32 = arith.constant 0 : i32
    %c0_i32_0 = arith.constant 0 : i32
    %c0_i32_1 = arith.constant 0 : i32
    %c0_i32_2 = arith.constant 0 : i32
    return %c0_i32, %c0_i32_0, %c0_i32_1 : i32, i32, i32
  }
  func.func @transform_10(%arg0: i32, %arg1: i32) -> (i32, i32) {
    %c0_i32 = arith.constant 0 : i32
    %c0_i32_0 = arith.constant 0 : i32
    %c0_i32_1 = arith.constant 0 : i32
    return %c0_i32, %c0_i32_0 : i32, i32
  }
  func.func @transform_11(%arg0: i32, %arg1: i32) -> (i32, i32) {
    %c0_i32 = arith.constant 0 : i32
    %c0_i32_0 = arith.constant 0 : i32
    %c0_i32_1 = arith.constant 0 : i32
    return %c0_i32, %c0_i32_0 : i32, i32
  }
  func.func @transform_12(%arg0: i32, %arg1: i32) -> (i32, i32) {
    %c0_i32 = arith.constant 0 : i32
    %c0_i32_0 = arith.constant 0 : i32
    %c0_i32_1 = arith.constant 0 : i32
    return %c0_i32, %c0_i32_0 : i32, i32
  }
  func.func @transform_13(%arg0: i32, %arg1: i32) -> (i32, i32) {
    %c0_i32 = arith.constant 0 : i32
    %c0_i32_0 = arith.constant 0 : i32
    %c0_i32_1 = arith.constant 0 : i32
    return %c0_i32, %c0_i32_0 : i32, i32
  }
  func.func @transform_14(%arg0: i32, %arg1: i32) -> (i32, i32, i32) {
    %c0_i32 = arith.constant 0 : i32
    %c0_i32_0 = arith.constant 0 : i32
    return %arg0, %arg1, %c0_i32 : i32, i32, i32
  }
  func.func @transform_15(%arg0: i32, %arg1: i32) -> (i32, i32, i32, i32) {
    %c0_i32 = arith.constant 0 : i32
    %c0_i32_0 = arith.constant 0 : i32
    %c0_i32_1 = arith.constant 0 : i32
    return %arg0, %c0_i32, %arg1, %c0_i32_0 : i32, i32, i32, i32
  }
}

</mosaic_0001>

<bundles_post_ra>
// kernel: tpu_custom_call.1
= control target key start
LH: loop header
LB: loop body
LE: loop exit
PB: predicated region body
PF: predicated region fallthrough
CT: control target
= control target key end

     0   :  { %s5818_s0 = inlined_call_operand.vmem [shape: bf16[2,32,32], index: 0, kind: input, shape index: {}]   ;;  %s5819_s1 = inlined_call_operand.hbm [shape: bf16[2,32,32], index: 1, kind: input, shape index: {}]   ;;  %s5820_s2 = inlined_call_operand.vmem [shape: bf16[2,32,16], index: 2, kind: input, shape index: {}]   ;;  %s5821_s3 = inlined_call_operand.vmem [shape: bf16[2,16,32], index: 3, kind: input, shape index: {}]   ;;  %s5822_s4 = inlined_call_operand.hbm [shape: bf16[2,16,32], index: 4, kind: input, shape index: {}]   ;;  %s5823_s5 = inlined_call_operand.hbm [shape: bf16[2,16,32], index: 5, kind: input, shape index: {}]   ;;  %s5824_s6 = inlined_call_operand.hbm [shape: bf16[2,32,32], index: 6, kind: input, shape index: {}]   ;;  %s5825_s7 = inlined_call_operand.hbm [shape: f32[2,1,32], index: 7, kind: input, shape index: {}]   ;;  %s5826_s8 = inlined_call_operand.hbm [shape: bf16[2,32,32], index: 8, kind: input, shape index: {}]   ;;  %s5827_s9 = inlined_call_operand.hbm [shape: f32[2,1,32], index: 9, kind: input, shape index: {}]   ;;  %s5828_s10 = inlined_call_operand.vmem [shape: bf16[32,32], index: 10, kind: input, shape index: {}]   ;;  %s5829_s11 = inlined_call_operand.vmem [shape: f32[1,32], index: 11, kind: input, shape index: {}]   ;;  %s5830_s12 = inlined_call_operand.hbm [shape: bf16[32,32], index: 12, kind: input, shape index: {}]   ;;  %s5831_s13 = inlined_call_operand.vmem [shape: f32[1,32], index: 13, kind: input, shape index: {}]   ;;  %s5832_s14 = inlined_call_operand.hbm [shape: f32[2,32,32], index: 14, kind: output, shape index: {0}]   ;;  %s5833_s15 = inlined_call_operand.vmem [shape: bf16[2,4,32,16], index: 15, kind: output, shape index: {1}]  }
   0x1   :  { %5863 = sst [smem:[#allocation40_spill]] %s5818_s0 }
   0x2   :  { %5864 = sst [smem:[#allocation41_spill]] %s5819_s1 }
   0x3   :  { %5865 = sst [smem:[#allocation42_spill]] %s5820_s2 }
   0x4   :  { %5866 = sst [smem:[#allocation43_spill]] %s5821_s3 }
   0x5   :  { %5867 = sst [smem:[#allocation44_spill]] %s5822_s4 }
   0x6   :  { %5868 = sst [smem:[#allocation45_spill]] %s5823_s5 }
   0x7   :  { %5869 = sst [smem:[#allocation46_spill]] %s5824_s6 }
   0x8   :  { %5870 = sst [smem:[#allocation47_spill]] %s5825_s7 }
   0x9   :  { %5871 = sst [smem:[#allocation48_spill]] %s5826_s8 }
   0xa   :  { %5872 = sst [smem:[#allocation49_spill]] %s5827_s9 }
   0xb   :  { %5873 = sst [smem:[#allocation50_spill]] %s5828_s10 }
   0xc   :  { %5874 = sst [smem:[#allocation51_spill]] %s5829_s11 }
   0xd   :  { %5875 = sst [smem:[#allocation52_spill]] %s5830_s12 }
   0xe   :  { %5876 = sst [smem:[#allocation53_spill]] %s5831_s13 }
   0xf   :  { %5877 = sst [smem:[#allocation54_spill]] %s5832_s14 }
  0x10   :  { %5878 = sst [smem:[#allocation55_spill]] %s5833_s15 }
  0x11   :  { %21 = vsyncpa [#allocation5], 0 }
  0x12   :  { %23 = vsyncpa [#allocation5 + $0x1], 0 }
  0x13   :  { %24 = vsyncpa [#allocation8], 0 }
  0x14   :  { %26 = vsyncpa [#allocation8 + $0x1], 0 }
  0x15   :  { %27 = vsyncpa [#allocation11], 0 }
  0x16   :  { %28 = vsyncpa [#allocation14], 0 }
  0x17   :  { %29 = vsyncpa [#allocation17], 0 }
  0x18   :  { %30 = vsyncpa [#allocation6], 0 }
  0x19   :  { %32 = vsyncpa [#allocation6 + $0x1], 0  ;;  %s4865_s18 = smov 0   ;;  %s4867_s19 = smov 0  }
  0x1a   :  { %s4869_s20 = smov 0   ;;  %s4871_s21 = smov 0  }
  0x1b   :  { %s4873_s22 = smov 0   ;;  %s4875_s23 = smov 0  }
  0x1c   :  { %s4877_s24 = smov 0   ;;  %s4879_s25 = smov 0  }
  0x1d   :  { %s4881_s26 = smov 0   ;;  %s4883_s27 = smov 0  }
  0x1e   :  { %s4885_s28 = smov 0  }
  0x1f LB: > { %5879 = sst [smem:[#allocation26_spill]] %s4714_s19  ;;  %s4921_s29 = sadd.s32 4294967295, %s4750_s28   ;;  %s4750_s28 = sphi %s4885_s28, %s38_s28   ;;  %s4746_s27 = sphi %s4883_s27, %s5956_s27   ;;  %s4742_s26 = sphi %s4881_s26, %s5955_s26   ;;  %s4738_s25 = sphi %s4879_s25, %s5954_s25   ;;  %s4734_s24 = sphi %s4877_s24, %s5953_s24   ;;  %s4730_s23 = sphi %s4875_s23, %s5952_s23   ;;  %s4726_s22 = sphi %s4873_s22, %s5960_s22   ;;  %s4722_s21 = sphi %s4871_s21, %s5959_s21   ;;  %s4718_s20 = sphi %s4869_s20, %s5958_s20   ;;  %s4714_s19 = sphi %s4867_s19, %s5957_s19   ;;  %s4710_s18 = sphi %s4865_s18, %s5950_s18  }
  0x20   : > { %5880 = sst [smem:[#allocation27_spill]] %s4722_s21  ;;  %p3871_p0 = scmp.ge.s32.totalorder %s4750_s28, 1 }
  0x21   : > { %5881 = sst [smem:[#allocation28_spill]] %s4730_s23  ;;  %p5844_p1 = scmp.eq.s32.totalorder %s4921_s29, 0 }
  0x22   : > { %5882 = sst [smem:[#allocation29_spill]] %s4734_s24  ;;  %p441_p2 = scmp.lt.s32.totalorder %s4750_s28, 5 }
  0x23   : > { %5883 = sst [smem:[#allocation30_spill]] %s4738_s25  ;;  %s4752_s16 = smov [#allocation10]  }
  0x24   : > { %5884 = sst [smem:[#allocation31_spill]] %s4742_s26  ;;  %p4926_p3 = pnand %p3871_p0, %p441_p2 }
  0x25   : > { %5885 = sst [smem:[#allocation32_spill]] %s4746_s27  ;;  %s453_s17 = sshll.u32 %s4752_s16, 4  ;;  %s454_s17 = int_to_ptr.vmem [resolvable:$true] %s453_s17 }
  0x26   : > { %s5886_s30 = scalar_select %p4926_p3, 1, 0 }
  0x27   : > { %p4184_p4 = pneg %p4926_p3  ;;  %s4753_s14 = smov [#allocation13]  }
  0x28   : > { %5887 = sst [smem:[#allocation33_spill]] %s5886_s30  ;;  %s479_s13 = sshll.u32 %s4753_s14, 4  ;;  %s480_s13 = int_to_ptr.vmem [resolvable:$true] %s479_s13 }
  0x29   : > { %p4934_p5 = pnand %p4184_p4, %p5844_p1  ;;  %s4411_s10 = scalar_lea.vmem %s454_s17, 512 }
  0x2a   : > { %p4412_p7 = scmp.ne.s32.totalorder %s454_s17, %s4411_s10  ;;  %p4419_p10 = scmp.lt.s32.totalorder %s454_s17, %s454_s17 }
  0x2b   : > { %p4940_p6 = pneg %p4934_p5  ;;  %p4420_p11 = scmp.lt.s32.totalorder %s4411_s10, %s4411_s10 }
  0x2d   : > { %p4414_p8 = pnand %p4412_p7, %p4940_p6  ;;  %p4421_p12 = por %p4420_p11, %p4419_p10 }
  0x2f   : > { %p4415_p9 = pneg %p4414_p8 }
  0x31   : > { %p4422_p13 = pnand %p4421_p12, %p4415_p9 }
  0x33   : > { %4425 = shalt.err (!%p4422_p13)
}
  0x34   : > { %s5839_s16 = smov 64   ;;  %s5841_s14 = smov 4  }
  0x35   : > { %s5890_s6 = sld [smem:[#allocation46_spill]]  ;;  %s4437_s3 = scalar_lea.vmem %s480_s13, 512 }
  0x36   : > { %p4438_p0 = scmp.ne.s32.totalorder %s480_s13, %s4437_s3  ;;  %p4445_p7 = scmp.lt.s32.totalorder %s480_s13, %s480_s13 }
  0x37   : > { %p4446_p8 = scmp.lt.s32.totalorder %s4437_s3, %s4437_s3 }
  0x38   : > { %p4440_p2 = pnand %p4438_p0, %p4940_p6 }
  0x39   : > { %p4447_p9 = por %p4446_p8, %p4445_p7 }
  0x3a   : > { %p4441_p4 = pneg %p4440_p2 }
  0x3b   : > { %4187 = dma.hbm_to_vmem [thread:$0]  (!%p4934_p5), %s5890_s6, 512, %s454_s17, [#allocation11], %s5839_s16, %s5839_s16, %s5841_s14  }
  0x3c   : > { %p4448_p10 = pnand %p4447_p9, %p4441_p4 }
  0x3e   : > { %4451 = shalt.err (!%p4448_p10)
}
  0x3f   : > { %s5891_s8 = sld [smem:[#allocation48_spill]]  ;;  %p5849_p11 = scmp.eq.s32.totalorder %s4750_s28, 0 }
  0x40   : > { %p174_p12 = scmp.ne.s32.totalorder %s4718_s20, %s4714_s19  ;;  %p180_p13 = scmp.ne.s32.totalorder %s4714_s19, %s4710_s18 }
  0x41   : > { %p5843_p0 = scmp.lt.s32.totalorder %s4750_s28, 4  ;;  %s585_s3 = sand.u32 1, %s4750_s28  }
  0x42   : > { %p176_p2 = por %p174_p12, %p5849_p11  ;;  %p4977_p4 = por %p180_p13, %p5844_p1 }
  0x43   : > { %s587_s17 = sand.u32 1, %s4718_s20   ;;  %s3995_s10 = sshll.u32 %s4746_s27, 7 }
  0x44   : > { %s5892_s25 = scalar_select %p4977_p4, 1, 0 }
  0x45   : > { %4193 = dma.hbm_to_vmem [thread:$0]  (!%p4934_p5), %s5891_s8, 512, %s480_s13, [#allocation14], %s5839_s16, %s5839_s16, %s5841_s14  }
  0x46   : > { %5893 = sst [smem:[#allocation34_spill]] %s5892_s25  ;;  %s3882_s6 = sshll.u32 %s587_s17, 3 }
  0x47   : > { %s5894_s4 = sld [smem:[#allocation44_spill]]  ;;  %p4988_p7 = pnand %p5843_p0, %p176_p2 }
  0x48   : > { %s589_s18 = scalar_lea.vmem [#allocation7], %s3882_s6  ;;  %s4992_s16 = scalar_lea.sflag [#allocation8], %s585_s3 }
  0x49   : > { %s5895_s2 = scalar_select %p4988_p7, 1, 0 }
  0x4a   : > { %s596_s0 = sshll.u32 %s589_s18, 4  ;;  %p5848_p8 = pneg %p4988_p7  ;;  %s597_s0 = int_to_ptr.vmem [resolvable:$true] %s596_s0 }
  0x4b   : > { %s4465_s14 = scalar_lea.vmem %s597_s0, 128  ;;  %s4756_s24 = smov [#allocation7]  }
  0x4c   : > { %p4466_p9 = scmp.ne.s32.totalorder %s597_s0, %s4465_s14  ;;  %s4470_s30 = sshll.u32 %s4756_s24, 4  ;;  %s4471_s30 = int_to_ptr.vmem [resolvable:$false] %s4470_s30 }
  0x4d   : > { %s595_s13 = scalar_lea.hbm %s5894_s4, %s3995_s10  ;;  %s4472_s17 = scalar_lea.vmem %s4471_s30, 256 }
  0x4e   : > { %p4468_p10 = pnand %p4466_p9, %p5848_p8  ;;  %p4473_p13 = scmp.lt.s32.totalorder %s597_s0, %s4471_s30 }
  0x4f   : > { %p4474_p2 = scmp.lt.s32.totalorder %s4472_s17, %s4465_s14 }
  0x50   : > { %p4469_p12 = pneg %p4468_p10 }
  0x51   : > { %p4475_p0 = por %p4474_p2, %p4473_p13 }
  0x53   : > { %p4476_p1 = pnand %p4475_p0, %p4469_p12 }
  0x55   : > { %4479 = shalt.err (!%p4476_p1)
}
  0x56   : > { %s5896_s3 = smov 4   ;;  %s5897_s18 = smov 64  }
  0x57   : > { %4206 = dma.hbm_to_vmem [thread:$0]  (!%p4988_p7), %s595_s13, 128, %s597_s0, %s4992_s16, %s5897_s18, %s5897_s18, %s5896_s3  }
  0x58   : > { %s5898_s5 = sld [smem:[#allocation45_spill]]  ;;  %s610_s24 = scalar_lea.vmem [#allocation9], %s3882_s6 }
  0x59   : > { %s617_s19 = sshll.u32 %s610_s24, 4  ;;  %s4757_s14 = smov [#allocation12]   ;;  %s5010_s19 = int_to_ptr.vmem [resolvable:$true] %s617_s19 }
  0x5a   : > { %s466_s30 = sshll.u32 %s4757_s14, 4  ;;  %s467_s30 = int_to_ptr.vmem [resolvable:$true] %s466_s30 }
  0x5b   : > { %s4491_s17 = scalar_lea.vmem %s467_s30, 32  ;;  %p4499_p10 = scmp.lt.s32.totalorder %s467_s30, %s467_s30 }
  0x5c   : > { %p4492_p1 = scmp.ne.s32.totalorder %s467_s30, %s4491_s17  ;;  %p4500_p12 = scmp.lt.s32.totalorder %s4491_s17, %s4491_s17 }
  0x5e   : > { %s5008_s25 = scalar_lea.hbm %s5898_s5, %s3995_s10  ;;  %p4494_p0 = pnand %p4492_p1, %p4940_p6 }
  0x5f   : > { %p4501_p13 = por %p4500_p12, %p4499_p10 }
  0x60   : > { %p4495_p9 = pneg %p4494_p0 }
  0x62   : > { %p4502_p2 = pnand %p4501_p13, %p4495_p9 }
  0x64   : > { %4505 = shalt.err (!%p4502_p2)
}
  0x65   : > { %s4758_s4 = smov 16   ;;  %s4759_s6 = smov 1  }
  0x66   : > { %s5899_s7 = sld [smem:[#allocation47_spill]]  ;;  %s4760_s10 = smov [#allocation15]  }
  0x67   : > { %s492_s13 = sshll.u32 %s4760_s10, 4  ;;  %s4761_s24 = smov [#allocation16]   ;;  %s493_s13 = int_to_ptr.vmem [resolvable:$true] %s492_s13 }
  0x68   : > { %s511_s14 = sshll.u32 %s4761_s24, 4  ;;  %s4517_s5 = scalar_lea.vmem %s493_s13, 32  ;;  %s512_s14 = int_to_ptr.vmem [resolvable:$true] %s511_s14 }
  0x69   : > { %p4518_p1 = scmp.ne.s32.totalorder %s493_s13, %s4517_s5  ;;  %p4525_p10 = scmp.lt.s32.totalorder %s493_s13, %s493_s13 }
  0x6a   : > { %p4526_p12 = scmp.lt.s32.totalorder %s4517_s5, %s4517_s5 }
  0x6b   : > { %p4520_p0 = pnand %p4518_p1, %p4940_p6 }
  0x6c   : > { %4190 = dma.hbm_to_vmem [thread:$0]  (!%p4934_p5), %s5899_s7, 32, %s467_s30, [#allocation11], %s4758_s4, %s4758_s4, %s4759_s6  }
  0x6d   : > { %p4521_p9 = pneg %p4520_p0  ;;  %p4527_p13 = por %p4526_p12, %p4525_p10 }
  0x6f   : > { %p4528_p2 = pnand %p4527_p13, %p4521_p9 }
  0x71   : > { %4531 = shalt.err (!%p4528_p2)
}
  0x72   : > { %s5900_s9 = sld [smem:[#allocation49_spill]]  ;;  %s4543_s8 = scalar_lea.vmem %s512_s14, 256 }
  0x73   : > { %p4544_p8 = scmp.ne.s32.totalorder %s512_s14, %s4543_s8  ;;  %p4551_p3 = scmp.lt.s32.totalorder %s512_s14, %s512_s14 }
  0x74   : > { %p4552_p1 = scmp.lt.s32.totalorder %s4543_s8, %s4543_s8 }
  0x75   : > { %p4546_p11 = pnand %p4544_p8, %p4940_p6 }
  0x76   : > { %p4553_p0 = por %p4552_p1, %p4551_p3 }
  0x77   : > { %p4547_p4 = pneg %p4546_p11 }
  0x78   : > { %4196 = dma.hbm_to_vmem [thread:$0]  (!%p4934_p5), %s5900_s9, 32, %s493_s13, [#allocation14], %s4758_s4, %s4758_s4, %s4759_s6  }
  0x79   : > { %p4554_p7 = pnand %p4553_p0, %p4547_p4 }
  0x7b   : > { %4557 = shalt.err (!%p4554_p7)
}
  0x7c   : > { %s5901_s12 = sld [smem:[#allocation52_spill]]  ;;  %s3870_s11 = sadd.s32 4294967294, %s4750_s28  }
  0x7d   : > { %s47_s15 = sadd.s32 1, %s4742_s26  ;;  %s87_s4 = sadd.s32 1, %s4730_s23 }
  0x7e   : > { %p48_p3 = scmp.ge.s32.totalorder %s47_s15, 2  ;;  %p94_p6 = scmp.ne.s32.totalorder %s4730_s23, %s4726_s22 }
  0x7f   : > { %p100_p11 = scmp.ne.s32.totalorder %s4726_s22, %s4722_s21  ;;  %s5903_s6 = sadd.s32 1, %s4746_s27 }
  0x80   : > { %s5962_s15 = smov (%p48_p3, %s47_s15), 0  ;;  %s5964_s6 = smov (!%p48_p3, %s5903_s6), %s4746_s27 }
  0x81   : > { %5902 = sst [smem:[#allocation35_spill]] %s5962_s15  ;;  %s83_s10 = ssub.s32 %s4742_s26, %s5962_s15 }
  0x82   : > { %4199 = dma.hbm_to_vmem [thread:$0]  (!%p4934_p5), %s5901_s12, 256, %s512_s14, [#allocation17], %s5897_s18, %s5897_s18, %s5896_s3  }
  0x83   : > { %p5904_p4 = scmp.eq.s32.totalorder %s4750_s28, 0  ;;  %p52_p7 = scmp.ge.s32.totalorder %s5964_s6, 2 }
  0x84   : > { %p5906_p8 = scmp.eq.s32.totalorder %s4921_s29, 0  ;;  %p400_p10 = scmp.eq.s32.totalorder %s4921_s29, 3 }
  0x85   : > { %p5052_p5 = por %p5904_p4, %p94_p6  ;;  %p406_p12 = scmp.eq.s32.totalorder %s3870_s11, 3 }
  0x86   : > { %p5058_p9 = por %p5906_p8, %p100_p11  ;;  %s5966_s6 = smov (%p52_p7, %s5964_s6), 0 }
  0x87   : > { %5908 = sst [smem:[#allocation36_spill]] %s5966_s6  ;;  %p5065_p13 = por %p400_p10, %p94_p6 }
  0x88   : > { %p5069_p2 = por %p406_p12, %p100_p11  ;;  %s82_s30 = ssub.s32 %s4746_s27, %s5966_s6 }
  0x89   : > { %s5909_s14 = scalar_select %p5065_p13, 1, 0 }
  0x8a   : > { %s5911_s17 = scalar_select %p5069_p2, 1, 0 }
  0x8b   : > { %5910 = sst [smem:[#allocation37_spill]] %s5909_s14  ;;  %s541_s8 = sand.u32 1, %s4730_s23  }
  0x8c   : > { %5912 = sst [smem:[#allocation38_spill]] %s5911_s17  ;;  %s84_s5 = sor.u32 %s83_s10, %s82_s30 }
  0x8d   : > { %p165_p1 = scmp.eq.s32.totalorder %s82_s30, 0  ;;  %p85_p0 = scmp.eq.s32.totalorder %s84_s5, 0 }
  0x8e   : > { %s5913_s0 = sadd.s32 1, %s4718_s20  ;;  %s3878_s9 = sshll.u32 %s541_s8, 3 }
  0x8f   : > { %s5079_s11 = scalar_select %p165_p1, %s4718_s20, %s5913_s0  }
  0x90   : > { %s5082_s7 = scalar_select %p85_p0, %s4730_s23, %s87_s4  }
  0x91   : > { %s3879_s12 = sshll.u32 %s4742_s26, 1  ;;  %s3880_s15 = sshll.u32 %s4746_s27, 2 }
  0x92   : > { %5914 = sst [smem:[#allocation39_spill]] %s5082_s7  ;;  %s551_s6 = sadd.s32 %s3880_s15, %s3879_s12 }
  0x93   : > { %s545_s17 = scalar_lea.vmem [#allocation4], %s3878_s9  ;;  %s3881_s14 = sshll.u32 %s551_s6, 6 }
  0x94   : > { %s554_s21 = sshll.u32 %s545_s17, 4  ;;  %s5915_s1 = sld [smem:[#allocation41_spill]]  ;;  %s5088_s21 = int_to_ptr.vmem [resolvable:$true] %s554_s21 }
  0x95   : > { %p5916_p3 = scmp.lt.s32.totalorder %s4750_s28, 4  ;;  %s4571_s0 = scalar_lea.vmem %s5010_s19, 128 }
  0x96   : > { %p4572_p11 = scmp.ne.s32.totalorder %s5010_s19, %s4571_s0  ;;  %p5918_p4 = scmp.ne.s32.totalorder %s5895_s2, 0 }
  0x97   : > { %p5099_p6 = pnand %p5916_p3, %p5052_p5  ;;  %s4762_s9 = smov [#allocation9]  }
  0x98   : > { %p5919_p7 = pneg %p5918_p4  ;;  %s4576_s12 = sshll.u32 %s4762_s9, 4  ;;  %s4577_s12 = int_to_ptr.vmem [resolvable:$false] %s4576_s12 }
  0x99   : > { %s4578_s15 = scalar_lea.vmem %s4577_s12, 256  ;;  %p4579_p12 = scmp.lt.s32.totalorder %s5010_s19, %s4577_s12 }
  0x9a   : > { %s5093_s5 = scalar_lea.hbm %s5915_s1, %s3881_s14  ;;  %p4574_p8 = pnand %p4572_p11, %p5919_p7 }
  0x9b   : > { %p4580_p1 = scmp.lt.s32.totalorder %s4578_s15, %s4571_s0 }
  0x9c   : > { %p4575_p10 = pneg %p4574_p8 }
  0x9d   : > { %p4581_p0 = por %p4580_p1, %p4579_p12 }
  0x9f   : > { %p4582_p2 = pnand %p4581_p0, %p4575_p10 }
  0xa1   : > { %4585 = shalt.err (!%p4582_p2)
}
  0xa2   : > { %4209 = dma.hbm_to_vmem [thread:$0]  (!%p5918_p4), %s5008_s25, 128, %s5010_s19, %s4992_s16, %s5897_s18, %s5897_s18, %s5896_s3  }
  0xa3   : > { %s542_s6 = scalar_lea.sflag [#allocation5], %s541_s8  ;;  %p4588_p5 = pneg %p5099_p6 }
  0xa4   : > { %s4599_s13 = scalar_lea.vmem %s5088_s21, 128  ;;  %s4763_s2 = smov [#allocation4]  }
  0xa5   : > { %p4600_p2 = scmp.ne.s32.totalorder %s5088_s21, %s4599_s13  ;;  %s4604_s14 = sshll.u32 %s4763_s2, 4  ;;  %s4605_s14 = int_to_ptr.vmem [resolvable:$false] %s4604_s14 }
  0xa6   : > { %s4606_s17 = scalar_lea.vmem %s4605_s14, 256  ;;  %p4607_p7 = scmp.lt.s32.totalorder %s5088_s21, %s4605_s14 }
  0xa7   : > { %p4602_p3 = pnand %p4600_p2, %p4588_p5  ;;  %p4608_p8 = scmp.lt.s32.totalorder %s4606_s17, %s4599_s13 }
  0xa9   : > { %p4603_p11 = pneg %p4602_p3  ;;  %p4609_p10 = por %p4608_p8, %p4607_p7 }
  0xab   : > { %p4610_p12 = pnand %p4609_p10, %p4603_p11 }
  0xad   : > { %4613 = shalt.err (!%p4610_p12)
}
  0xae   : > { %4203 = dma.hbm_to_vmem [thread:$0]  (!%p5099_p6), %s5093_s5, 128, %s5088_s21, %s542_s6, %s5897_s18, %s5897_s18, %s5896_s3  }
  0xaf   : > { %s5920_s19 = sld [smem:[#allocation33_spill]] }
  0xb5   : > { %p5921_p4 = scmp.ne.s32.totalorder %s5920_s19, 0 }
  0xb6   : > { %s5134_s16 = sand.u32 (!%p5921_p4), 1, %s4726_s22  }
  0xb7   : > { %629 = sbr.rel (%p5921_p4) target bundleno = 2312 (0x908), region = 76  ;;  %s3889_s25 = sshll.u32 (!%p5921_p4), %s5134_s16, 3 }
  0xb8   : > { %s632_s8 = scalar_lea.sflag (!%p5921_p4), [#allocation5], %s5134_s16  ;;  %s5138_s10 = scalar_lea.vmem (!%p5921_p4), [#allocation4], %s3889_s25 }
  0xbc   : > { %4685 = dma.done.wait (%p5058_p9), %s632_s8, 128  }
  0xbd   : > { %4687 = vsyncadd (%p5058_p9), %s632_s8, 4294967168  ;;  %s5922_s21 = sld [smem:[#allocation26_spill]]  ;;  %s640_s18 = sand.u32 1, %s4921_s29  }
  0xbe   : > { %s5923_s3 = sld [smem:[#allocation34_spill]]  ;;  %s641_s4 = scalar_lea.sflag [#allocation8], %s640_s18 }
  0xc3   : > { %s642_s30 = sand.u32 1, %s5922_s21  }
  0xc4   : > { %s5146_s5 = sshll.u32 %s642_s30, 3  ;;  %p5924_p6 = scmp.ne.s32.totalorder %s5923_s3, 0 }
  0xc6   : > { %4689 = dma.done.wait (%p5924_p6), %s641_s4, 256  }
  0xc7   : > { %4691 = vsyncadd (%p5924_p6), %s641_s4, 4294967040  ;;  %p5925_p1 = scmp.eq.s32.totalorder %s4921_s29, 0 }
  0xc9   : > { %4693 = dma.done.wait (%p5925_p1), [#allocation11], 544   ;;  %p5926_p9 = pmov %p5925_p1 }
  0xca   : > { %p5927_p0 = pmov %p5925_p1 }
  0xcb   : > { %4695 = vsyncadd (%p5926_p9), [#allocation11], 4294966752 }
  0xcc   : > { %4697 = dma.done.wait (%p5927_p0), [#allocation14], 544   ;;  %p5928_p5 = pmov %p5927_p0 }
  0xcd   : > { %p5929_p2 = pmov %p5927_p0 }
  0xce   : > { %4699 = vsyncadd (%p5928_p5), [#allocation14], 4294966752 }
  0xcf   : > { %4701 = dma.done.wait (%p5929_p2), [#allocation17], 256   ;;  %p5930_p3 = pmov %p5927_p0 }
  0xd0   : > { %s5931_s24 = sld [smem:[#allocation29_spill]]  ;;  %s3897_s15 = sshll.u32 %s5134_s16, 4 }
  0xd1   : > { %4703 = vsyncadd (%p5930_p3), [#allocation17], 4294967040  ;;  %s5932_s12 = sld [smem:[#allocation30_spill]]  ;;  %s3898_s6 = sshll.u32 %s5134_s16, 5 }
  0xd2   : > { %s5933_s8 = sld [smem:[#allocation43_spill]]  ;;  %s5188_s7 = scalar_lea.vmem [#allocation18], %s3897_s15 }
  0xd3   : > { %s5934_s4 = sld [smem:[#allocation40_spill]]  ;;  %s5190_s23 = scalar_lea.vmem [#allocation19], %s3898_s6 }
  0xd4   : > { %s5935_s27 = sld [smem:[#allocation42_spill]] }
  0xd6   : > { %s5169_s13 = sshll.u32 %s5931_s24, 1  ;;  %p3907_p8 = scmp.ne.s32.totalorder %s5931_s24, 0 }
  0xd7   : > { %p758_p11 = scmp.lt.s32.totalorder %s5932_s12, 1  ;;  %p760_p7 = scmp.lt.s32.totalorder %s5169_s13, 3 }
  0xd8   : > { %s5936_s1 = scalar_lea.vmem (!%p3907_p8), [#allocation7], %s5146_s5  ;;  %s5937_s24 = sld [smem:[#allocation50_spill]] (!%p3907_p8) }
  0xd9   : > { %s5968_s12 = smov (!%p758_p11, %s5932_s12), 1  ;;  %s5940_s25 = sld [smem:[#allocation51_spill]] (!%p3907_p8) }
  0xda   : > { %s761_s2 = scalar_select %p760_p7, %s5169_s13, 3 }
  0xdb   : > { %s3900_s14 = sshll.u32 %s5968_s12, 2  ;;  %s3997_s17 = sshll.u32 %s5968_s12, 3 }
  0xdc   : > { %s763_s19 = sadd.s32 %s3900_s14, %s761_s2  ;;  %s782_s21 = scalar_lea.vmem %s5933_s8, %s3997_s17 }
  0xdd   : > { %s3901_s3 = sshll.u32 %s763_s19, 2  ;;  %789 = sbr.rel (%p3907_p8) target bundleno = 721 (0x2d1), region = 112 }
  0xde   : > { %s5181_s9 = scalar_lea.vmem %s5934_s4, %s3901_s3  ;;  %s5186_s26 = scalar_lea.vmem %s5935_s27, %s3901_s3 }
  0xdf   : > { %s5938_s12 = smov (!%p3907_p8), %s5937_s24  ;;  %s5939_s2 = scalar_lea.vmem (!%p3907_p8), [#allocation9], %s5146_s5 }
  0xe0   : > { %s4766_s14 = smov (!%p3907_p8), 112   ;;  %s4767_s17 = smov (!%p3907_p8), 120  }
  0xe1   : > { %s4768_s5 = smov (!%p3907_p8), 104   ;;  %s4771_s8 = smov (!%p3907_p8), 8  }
  0xe2   : > { %v4343_v0 = vld [vmem:[#allocation13 + $0x18] sm:$0xff]   ;;  %v4764_v1 = vmov 0.0   ;;  %v4344_v2 = vld [vmem:[#allocation13 + $0x10] sm:$0xff]   ;;  %vm4765_vm0 = vmmov 0   ;;  %v4346_v3 = vld [vmem:[#allocation13 + $0x8] sm:$0xff]   ;;  %vm824_vm1 = vcmask 261120   ;;  %v1040_v33 = vlaneseq }
  0xe3   : > { %4068 = vmatprep.subr.bf16.mxu1 %v4764_v1  ;;  %4060 = vmatprep.subr.bf16.mxu0 %v4764_v1  ;;  %v4345_v4 = vld [vmem:[%s5936_s1] sm:$0xff]   ;;  %v4348_v6 = vld [vmem:[%s782_s21] sm:$0xff]   ;;  %v4349_v7 = vld [vmem:[%s5937_s24 + $0x8] sm:$0xff]   ;;  %v4769_v31 = vmov 1983009808   ;;  %vm1909_vm2 = vcmask 60416  }
  0xe4   : > { %4069 = vmatpush3.bf16.msra.mxu1 %v4343_v0  ;;  %4072 = vmatprep.mubr.msk.bf16.mxu1 %vm4765_vm0, %v4764_v1  ;;  %v4347_v5 = vld [vmem:[#allocation13] sm:$0xff]   ;;  %v4350_v8 = vld [vmem:[%s5938_s12] sm:$0xff]   ;;  %v1038_v32 = vunpack.c.l.s4 %v4769_v31  ;;  %v1041_v37 = vshrl.u32 %v1040_v33, 7  ;;  %v4770_v40 = vmov 1934713408   ;;  %vm1391_vm3 = vcmask 64512  }
  0xe5   : > { %4070 = vmatprep.subr.bf16.mxu1 %v4764_v1  ;;  %4064 = vmatprep.mubr.msk.bf16.mxu0 %vm4765_vm0, %v4764_v1  ;;  %v4351_v9 = vld [vmem:[%s5939_s2] sm:$0xff]   ;;  %v3913_v10 = vld [vmem:[#allocation15 + $0x1] ss:$0 sm:$0xff]  ;;  %v3908_v20 = vld [vmem:[#allocation15] ss:$0 sm:$0xff]  ;;  %v1070_v41 = vunpack.c.l.s4 %v4770_v40  ;;  %vm1576_vm4 = vcmask 125952  }
  0xe6   : > { %4061 = vmatpush3.bf16.msra.mxu0 %v4346_v3  ;;  %v3918_v28 = vld [vmem:[%s5940_s25] ss:$0 sm:$0xff]  ;;  %v1039_v36 = vunpack.c.0.s8 %v1038_v32 }
  0xe7   : > { %4062 = vmatprep.subr.bf16.mxu0 %v4764_v1  ;;  %v1071_v46 = vunpack.c.0.s8 %v1070_v41 }
  0xe8   : > { %4071 = vmatpush3.bf16.msra.mxu1 %v4344_v2  ;;  %v5260_v42 = vsub.s32 %v1039_v36, %v1041_v37 }
  0xe9   : > { %v5267_v56 = vsub.s32 %v1071_v46, %v1041_v37 }
  0xea   : > { %4063 = vmatpush3.bf16.msra.mxu0 %v4347_v5 }
  0xeb   : > { %4073 = vmatmul.mubr.msk.bf16.vlgmr.msra.gmra.mxu1 %vm824_vm1, %v4345_v4  ;;  %4076 = vmatprep.subr.bf16.mxu0 %v4764_v1 }
  0xed   : > { %4065 = vmatmul.mubr.msk.bf16.vlgmr.msra.gmra.mxu0 %vm824_vm1, %v4348_v6 }
  0xee   : > { %4077 = vmatpush3.bf16.msra.mxu0 %v4349_v7  ;;  %4080 = vmatprep.mubr.msk.bf16.mxu0 %vm4765_vm0, %v4764_v1 }
  0xef   : > { %4078 = vmatprep.subr.bf16.mxu0 %v4764_v1 }
  0xf2   : > { %4079 = vmatpush3.bf16.msra.mxu0 %v4350_v8 }
  0xf5   : > { %4081 = vmatmul.mubr.msk.bf16.vlgmr.msra.gmra.mxu0 %vm824_vm1, %v4351_v9 }
 0x1ab   : > { %v936_v11 = vpop.f32.mrf.mxu1 }
 0x1ac   : > { %v5215_v12 = vadd.f32 %v3913_v10, %v936_v11 }
 0x1ad   : > { %v4074_v13 = vpop.f32.mrf.mxu1  ;;  %v862_v14 = vpop.f32.mrf.mxu0 }
 0x1ae   : > { %1179 = vrot.lane.b32.xlu1 %v5215_v12, %s4766_s14  ;;  %1173 = vrot.lane.b32.xlu0 %v5215_v12, %s4767_s17  ;;  %v5227_v22 = vadd.f32 %v3908_v20, %v862_v14 }
 0x1af   : > { %v939_v15 = vpop.f32.mrf.mxu1  ;;  %v4066_v17 = vpop.f32.mrf.mxu0 }
 0x1b0   : > { %v5221_v16 = vadd.f32 %v3913_v10, %v939_v15 }
 0x1b1   : > { %v4075_v18 = vpop.f32.mrf.mxu1  ;;  %v865_v19 = vpop.f32.mrf.mxu0 }
 0x1b2   : > { %1181 = vrot.lane.b32.xlu1 %v5221_v16, %s4766_s14  ;;  %1175 = vrot.lane.b32.xlu0 %v5221_v16, %s4767_s17  ;;  %v5231_v23 = vadd.f32 %v3908_v20, %v865_v19 }
 0x1b3   : > { %v4067_v21 = vpop.f32.mrf.mxu0 }
 0x1b5   : > { %v1008_v24 = vpop.f32.mrf.mxu0 }
 0x1b6   : > { %1187 = vrot.lane.b32.xlu1 %v5221_v16, %s4768_s5  ;;  %1185 = vrot.lane.b32.xlu0 %v5215_v12, %s4768_s5  ;;  %v5244_v29 = vadd.f32 %v3918_v28, %v1008_v24 }
 0x1b7   : > { %v4082_v25 = vpop.f32.mrf.mxu0 }
 0x1b9   : > { %v1011_v26 = vpop.f32.mrf.mxu0 }
 0x1ba   : > { %1017 = vrot.lane.b32.xlu0 %v5227_v22, %s4767_s17  ;;  %1019 = vrot.lane.b32.xlu1 %v5231_v23, %s4767_s17  ;;  %v5248_v30 = vadd.f32 %v3918_v28, %v1011_v26 }
 0x1bb   : > { %v4083_v27 = vpop.f32.mrf.mxu0 }
 0x1be   : > { %1023 = vrot.lane.b32.xlu0 %v5227_v22, %s4766_s14  ;;  %1025 = vrot.lane.b32.xlu1 %v5231_v23, %s4766_s14 }
 0x1c2   : > { %1029 = vrot.lane.b32.xlu0 %v5227_v22, %s4768_s5  ;;  %1031 = vrot.lane.b32.xlu1 %v5231_v23, %s4768_s5 }
 0x1c6   : > { %1587 = vrot.lane.b32.xlu0 %v5244_v29, %s4767_s17  ;;  %1589 = vrot.lane.b32.xlu1 %v5248_v30, %s4767_s17 }
 0x1ca   : > { %1593 = vrot.lane.b32.xlu0 %v5244_v29, %s4766_s14  ;;  %1595 = vrot.lane.b32.xlu1 %v5248_v30, %s4766_s14 }
 0x1ce   : > { %1599 = vrot.lane.b32.xlu0 %v5244_v29, %s4768_s5  ;;  %1601 = vrot.lane.b32.xlu1 %v5248_v30, %s4768_s5 }
 0x220   : > { %v1180_v34 = vpop.permute.xlu1 %1179  ;;  %v1174_v35 = vpop.permute.xlu0 %1173 }
 0x221   : > { %v1191_v43 = vcombine.low %v5215_v12, %v1180_v34  ;;  %v1192_v49 = vcombine.high %v5215_v12, %v1180_v34 }
 0x223   : > { %v1199_v52 = vrot.slane %v1191_v43, %v5260_v42  ;;  %v1206_v58 = vrot.slane %v1192_v49, %v5260_v42 }
 0x224   : > { %v1182_v38 = vpop.permute.xlu1 %1181  ;;  %v1176_v39 = vpop.permute.xlu0 %1175 }
 0x225   : > { %v1259_v57 = vcombine.low %v5221_v16, %v1182_v38  ;;  %v1260_v61 = vcombine.high %v5221_v16, %v1182_v38 }
 0x227   : > { %v1267_v5 = vrot.slane %v1259_v57, %v5260_v42  ;;  %v1274_v10 = vrot.slane %v1260_v61, %v5260_v42 }
 0x228   : > { %v1188_v44 = vpop.permute.xlu1 %1187  ;;  %v1186_v45 = vpop.permute.xlu0 %1185 }
 0x229   : > { %v1207_v47 = vcombine.low %v1174_v35, %v1186_v45  ;;  %v1208_v48 = vcombine.high %v1174_v35, %v1186_v45  ;;  %v1275_v50 = vcombine.low %v1176_v39, %v1188_v44  ;;  %v1276_v62 = vcombine.high %v1176_v39, %v1188_v44 }
 0x22b   : > { %v1215_v51 = vrot.slane %v1207_v47, %v5260_v42  ;;  %v1222_v53 = vrot.slane %v1208_v48, %v5260_v42  ;;  %v1283_v63 = vrot.slane %v1275_v50, %v5260_v42  ;;  %v1290_v11 = vrot.slane %v1276_v62, %v5260_v42 }
 0x22c   : > { %v1018_v54 = vpop.permute.xlu0 %1017  ;;  %v1020_v55 = vpop.permute.xlu1 %1019 }
 0x22d   : > { %v1223_v59 = vcombine.low %v1199_v52, %v1215_v51  ;;  %v1224_v60 = vcombine.high %v1199_v52, %v1215_v51  ;;  %v1239_v0 = vcombine.low %v1206_v58, %v1222_v53  ;;  %v1291_v12 = vcombine.low %v1267_v5, %v1283_v63 }
 0x22e   : > { %v1240_v13 = vcombine.high %v1206_v58, %v1222_v53  ;;  %v1292_v24 = vcombine.high %v1267_v5, %v1283_v63  ;;  %v1307_v48 = vcombine.low %v1274_v10, %v1290_v11  ;;  %v1308_v49 = vcombine.high %v1274_v10, %v1290_v11 }
 0x22f   : > { %v1231_v4 = vrot.slane %v1223_v59, %v5267_v56  ;;  %v1238_v9 = vrot.slane %v1224_v60, %v5267_v56  ;;  %v1247_v18 = vrot.slane %v1239_v0, %v5267_v56  ;;  %v1299_v52 = vrot.slane %v1291_v12, %v5267_v56 }
 0x230   : > { %v1024_v2 = vpop.permute.xlu0 %1023  ;;  %v1026_v3 = vpop.permute.xlu1 %1025  ;;  %v1254_v38 = vrot.slane %v1240_v13, %v5267_v56  ;;  %v1306_v57 = vrot.slane %v1292_v24, %v5267_v56  ;;  %v1315_v62 = vrot.slane %v1307_v48, %v5267_v56  ;;  %v5344_v63 = vrot.slane %v1308_v49, %v5267_v56 }
 0x231   : > { %v1035_v6 = vcombine.low %v5227_v22, %v1024_v2  ;;  %v1036_v7 = vcombine.high %v5227_v22, %v1024_v2  ;;  %1343 = vrot.lane.b32.xlu0 %v1231_v4, %s4771_s8  ;;  %v1255_v8 = vcombine.high %v1231_v4, %v4764_v1  ;;  %v1103_v14 = vcombine.low %v5231_v23, %v1026_v3 }
 0x232   : > { %v1104_v15 = vcombine.high %v5231_v23, %v1026_v3  ;;  %v1256_v23 = vcombine.high %v1238_v9, %v4764_v1  ;;  %v1257_v37 = vcombine.high %v1247_v18, %v4764_v1  ;;  %v1325_v13 = vcombine.high %v1315_v62, %v4764_v1 }
 0x233   : > { %1345 = vrot.lane.b32.xlu1 %v1255_v8, %s4771_s8  ;;  %v5287_v25 = vrot.slane %v1035_v6, %v5260_v42  ;;  %v5290_v26 = vrot.slane %v1036_v7, %v5260_v42  ;;  %v5307_v33 = vrot.slane %v1103_v14, %v5260_v42  ;;  %v1324_v6 = vcombine.high %v1306_v57, %v4764_v1 }
 0x234   : > { %v1030_v16 = vpop.permute.xlu0 %1029  ;;  %v1032_v17 = vpop.permute.xlu1 %1031  ;;  %v5310_v34 = vrot.slane %v1104_v15, %v5260_v42  ;;  %v1326_v14 = vcombine.high %v5344_v63, %v4764_v1 }
 0x235   : > { %v1051_v19 = vcombine.low %v1018_v54, %v1030_v16  ;;  %v1052_v20 = vcombine.high %v1018_v54, %v1030_v16  ;;  %v1119_v21 = vcombine.low %v1020_v55, %v1032_v17  ;;  %v1120_v22 = vcombine.high %v1020_v55, %v1032_v17  ;;  %1347 = vrot.lane.b32.xlu0 %v1238_v9, %s4771_s8 }
 0x236   : > { %v1258_v55 = vcombine.high %v1254_v38, %v4764_v1 }
 0x237   : > { %v5295_v27 = vrot.slane %v1051_v19, %v5260_v42  ;;  %v5298_v28 = vrot.slane %v1052_v20, %v5260_v42  ;;  %v5301_v31 = vrot.slane %v1119_v21, %v5260_v42  ;;  %v5304_v32 = vrot.slane %v1120_v22, %v5260_v42  ;;  %1349 = vrot.lane.b32.xlu1 %v1256_v23, %s4771_s8 }
 0x238   : > { %v1588_v35 = vpop.permute.xlu0 %1587  ;;  %v1590_v36 = vpop.permute.xlu1 %1589 }
 0x239   : > { %v1067_v39 = vcombine.low %v5287_v25, %v5295_v27  ;;  %v1068_v40 = vcombine.high %v5287_v25, %v5295_v27  ;;  %v1083_v41 = vcombine.low %v5290_v26, %v5298_v28  ;;  %v1084_v43 = vcombine.high %v5290_v26, %v5298_v28  ;;  %1351 = vrot.lane.b32.xlu0 %v1247_v18, %s4771_s8 }
 0x23a   : > { %v1135_v44 = vcombine.low %v5307_v33, %v5301_v31  ;;  %v1136_v45 = vcombine.high %v5307_v33, %v5301_v31  ;;  %v1151_v46 = vcombine.low %v5310_v34, %v5304_v32  ;;  %v1152_v47 = vcombine.high %v5310_v34, %v5304_v32 }
 0x23b   : > { %1353 = vrot.lane.b32.xlu1 %v1257_v37, %s4771_s8  ;;  %v1091_v27 = vrot.slane %v1083_v41, %v5267_v56 }
 0x23c   : > { %v1594_v50 = vpop.permute.xlu0 %1593  ;;  %v1596_v51 = vpop.permute.xlu1 %1595 }
 0x23d   : > { %v1605_v53 = vcombine.low %v5244_v29, %v1594_v50  ;;  %v1606_v54 = vcombine.high %v5244_v29, %v1594_v50  ;;  %1355 = vrot.lane.b32.xlu0 %v1254_v38, %s4771_s8  ;;  %v1673_v58 = vcombine.low %v5248_v30, %v1596_v51  ;;  %v1674_v59 = vcombine.high %v5248_v30, %v1596_v51 }
 0x23e   : > { %v1323_v30 = vcombine.high %v1299_v52, %v4764_v1 }
 0x23f   : > { %1357 = vrot.lane.b32.xlu1 %v1258_v55, %s4771_s8  ;;  %v1613_v4 = vrot.slane %v1605_v53, %v5260_v42  ;;  %v1620_v5 = vrot.slane %v1606_v54, %v5260_v42  ;;  %v1681_v11 = vrot.slane %v1673_v58, %v5260_v42  ;;  %v1688_v12 = vrot.slane %v1674_v59, %v5260_v42 }
 0x240   : > { %v1600_v60 = vpop.permute.xlu0 %1599  ;;  %v1602_v61 = vpop.permute.xlu1 %1601 }
 0x241   : > { %v1621_v29 = vcombine.low %v1588_v35, %v1600_v60  ;;  %v1622_v0 = vcombine.high %v1588_v35, %v1600_v60  ;;  %v1689_v2 = vcombine.low %v1590_v36, %v1602_v61  ;;  %v1690_v3 = vcombine.high %v1590_v36, %v1602_v61  ;;  %1359 = vrot.lane.b32.xlu0 %v1299_v52, %s4771_s8 }
 0x243   : > { %v1629_v7 = vrot.slane %v1621_v29, %v5260_v42  ;;  %v1636_v8 = vrot.slane %v1622_v0, %v5260_v42  ;;  %v1697_v9 = vrot.slane %v1689_v2, %v5260_v42  ;;  %v1704_v10 = vrot.slane %v1690_v3, %v5260_v42  ;;  %1361 = vrot.lane.b32.xlu1 %v1323_v30, %s4771_s8 }
 0x245   : > { %v1637_v15 = vcombine.low %v1613_v4, %v1629_v7  ;;  %v1638_v16 = vcombine.high %v1613_v4, %v1629_v7  ;;  %v1653_v17 = vcombine.low %v1620_v5, %v1636_v8  ;;  %v1654_v18 = vcombine.high %v1620_v5, %v1636_v8  ;;  %1363 = vrot.lane.b32.xlu0 %v1306_v57, %s4771_s8 }
 0x246   : > { %v1705_v19 = vcombine.low %v1681_v11, %v1697_v9  ;;  %v1706_v20 = vcombine.high %v1681_v11, %v1697_v9  ;;  %v1721_v21 = vcombine.low %v1688_v12, %v1704_v10  ;;  %v1722_v22 = vcombine.high %v1688_v12, %v1704_v10 }
 0x247   : > { %v1645_v24 = vrot.slane %v1637_v15, %v5267_v56  ;;  %v1652_v23 = vrot.slane %v1638_v16, %v5267_v56  ;;  %v1661_v35 = vrot.slane %v1653_v17, %v5267_v56  ;;  %v1668_v36 = vrot.slane %v1654_v18, %v5267_v56  ;;  %1365 = vrot.lane.b32.xlu1 %v1324_v6, %s4771_s8 }
 0x248   : > { %v1713_v37 = vrot.slane %v1705_v19, %v5267_v56  ;;  %v1720_v38 = vrot.slane %v1706_v20, %v5267_v56  ;;  %v1729_v48 = vrot.slane %v1721_v21, %v5267_v56  ;;  %v1736_v49 = vrot.slane %v1722_v22, %v5267_v56 }
 0x249   : > { %v1741_v50 = vcombine.low %v1645_v24, %v1652_v23  ;;  %v3931_v51 = vcombine.high %v1645_v24, %v1652_v23  ;;  %v1757_v52 = vcombine.low %v1661_v35, %v1668_v36  ;;  %v3932_v53 = vcombine.high %v1661_v35, %v1668_v36  ;;  %1367 = vrot.lane.b32.xlu0 %v1315_v62, %s4771_s8 }
 0x24a   : > { %v1809_v54 = vcombine.low %v1713_v37, %v1720_v38  ;;  %v3933_v55 = vcombine.high %v1713_v37, %v1720_v38  ;;  %v1825_v57 = vcombine.low %v1729_v48, %v1736_v49  ;;  %v3934_v58 = vcombine.high %v1729_v48, %v1736_v49 }
 0x24b   : > { %v1748_v59 = vrot.slane %v1741_v50, %v5260_v42  ;;  %v1756_v60 = vrot.slane %v3931_v51, %v5260_v42  ;;  %v1764_v61 = vrot.slane %v1757_v52, %v5260_v42  ;;  %v1772_v29 = vrot.slane %v3932_v53, %v5260_v42  ;;  %1369 = vrot.lane.b32.xlu1 %v1325_v13, %s4771_s8 }
 0x24c   : > { %v1816_v0 = vrot.slane %v1809_v54, %v5260_v42  ;;  %v1824_v2 = vrot.slane %v3933_v55, %v5260_v42  ;;  %v1832_v3 = vrot.slane %v1825_v57, %v5260_v42  ;;  %v1840_v4 = vrot.slane %v3934_v58, %v5260_v42 }
 0x24d   : > { %v1773_v5 = vcombine.low %v1748_v59, %v1756_v60  ;;  %v1774_v62 = vcombine.high %v1748_v59, %v1756_v60  ;;  %v1789_v30 = vcombine.low %v1764_v61, %v1772_v29  ;;  %v1790_v6 = vcombine.high %v1764_v61, %v1772_v29  ;;  %1371 = vrot.lane.b32.xlu0 %v5344_v63, %s4771_s8 }
 0x24e   : > { %v1841_v7 = vcombine.low %v1816_v0, %v1824_v2  ;;  %v1842_v8 = vcombine.high %v1816_v0, %v1824_v2  ;;  %v1857_v9 = vcombine.low %v1832_v3, %v1840_v4  ;;  %v1858_v10 = vcombine.high %v1832_v3, %v1840_v4 }
 0x24f   : > { %v1781_v11 = vrot.slane %v1773_v5, %v5267_v56  ;;  %v1788_v12 = vrot.slane %v1774_v62, %v5267_v56  ;;  %v1797_v15 = vrot.slane %v1789_v30, %v5267_v56  ;;  %v1804_v16 = vrot.slane %v1790_v6, %v5267_v56  ;;  %1373 = vrot.lane.b32.xlu1 %v1326_v14, %s4771_s8 }
 0x250   : > { %v1849_v13 = vrot.slane %v1841_v7, %v5267_v56  ;;  %v1856_v17 = vrot.slane %v1842_v8, %v5267_v56  ;;  %v1865_v18 = vrot.slane %v1857_v9, %v5267_v56  ;;  %v1872_v19 = vrot.slane %v1858_v10, %v5267_v56 }
 0x251   : > { %v1805_v20 = vcombine.low %v1781_v11, %v1797_v15  ;;  %v1806_v63 = vcombine.high %v1781_v11, %v1797_v15  ;;  %v1807_v21 = vcombine.low %v1788_v12, %v1804_v16  ;;  %v1808_v22 = vcombine.high %v1788_v12, %v1804_v16 }
 0x252   : > { %v1873_v24 = vcombine.low %v1849_v13, %v1865_v18  ;;  %v1874_v23 = vcombine.high %v1849_v13, %v1865_v18  ;;  %v1875_v35 = vcombine.low %v1856_v17, %v1872_v19  ;;  %v1876_v36 = vcombine.high %v1856_v17, %v1872_v19 }
 0x253   : > { %v4006_v37 = vpack.c.bf16 %v1805_v20, %v1805_v20  ;;  %v4008_v38 = vpack.c.bf16 %v1806_v63, %v1806_v63  ;;  %v4010_v48 = vpack.c.bf16 %v1807_v21, %v1807_v21  ;;  %v4012_v49 = vpack.c.bf16 %v1808_v22, %v1808_v22 }
 0x254   : > { %v4007_v50 = vpack.c.bf16 %v1873_v24, %v1873_v24  ;;  %v4009_v51 = vpack.c.bf16 %v1874_v23, %v1874_v23  ;;  %v4011_v52 = vpack.c.bf16 %v1875_v35, %v1875_v35  ;;  %v4013_v53 = vpack.c.bf16 %v1876_v36, %v1876_v36 }
 0x255   : > { %1910 = vst.msk [vmem:[#allocation3] sm:$0xf] %vm1909_vm2, %v4006_v37  ;;  %1912 = vst.msk [vmem:[#allocation3 + $0x8] sm:$0xf] %vm1909_vm2, %v4008_v38  ;;  %v1075_v54 = vrot.slane %v1067_v39, %v5267_v56  ;;  %v1082_v55 = vrot.slane %v1068_v40, %v5267_v56  ;;  %v1098_v40 = vrot.slane %v1084_v43, %v5267_v56 }
 0x256   : > { %1914 = vst.msk [vmem:[#allocation3 + $0x10] sm:$0xf] %vm1909_vm2, %v4010_v48  ;;  %1916 = vst.msk [vmem:[#allocation3 + $0x18] sm:$0xf] %vm1909_vm2, %v4012_v49  ;;  %v1101_v10 = vcombine.high %v1091_v27, %v4764_v1  ;;  %v1143_v16 = vrot.slane %v1135_v44, %v5267_v56  ;;  %v1150_v17 = vrot.slane %v1136_v45, %v5267_v56 }
 0x257   : > { %1911 = vst.msk [vmem:[#allocation3 + $0x4] sm:$0xf] %vm1909_vm2, %v4007_v50  ;;  %1913 = vst.msk [vmem:[#allocation3 + $0xc] sm:$0xf] %vm1909_vm2, %v4009_v51  ;;  %v1099_v60 = vcombine.high %v1075_v54, %v4764_v1  ;;  %v1100_v29 = vcombine.high %v1082_v55, %v4764_v1  ;;  %v1102_v41 = vcombine.high %v1098_v40, %v4764_v1 }
 0x258   : > { %1915 = vst.msk [vmem:[#allocation3 + $0x14] sm:$0xf] %vm1909_vm2, %v4011_v52  ;;  %1917 = vst.msk [vmem:[#allocation3 + $0x1c] sm:$0xf] %vm1909_vm2, %v4013_v53  ;;  %v1167_v22 = vcombine.high %v1143_v16, %v4764_v1  ;;  %v1168_v36 = vcombine.high %v1150_v17, %v4764_v1  ;;  %v1159_v50 = vrot.slane %v1151_v46, %v5267_v56 }
 0x259   : > { %v1166_v51 = vrot.slane %v1152_v47, %v5267_v56 }
 0x25a   : > { %v1169_v32 = vcombine.high %v1159_v50, %v4764_v1 }
 0x25b   : > { %v1170_v47 = vcombine.high %v1166_v51, %v4764_v1 }
 0x2a3   : > { %v1344_v14 = vpop.permute.xlu0 %1343 }
 0x2a4   : > { %v1392_v59 = vsel %vm1391_vm3, %v1075_v54, %v1344_v14 }
 0x2a5   : > { %v1346_v57 = vpop.permute.xlu1 %1345 }
 0x2a6   : > { %v1393_v39 = vsel %vm1391_vm3, %v1099_v60, %v1346_v57 }
 0x2a7   : > { %v1348_v58 = vpop.permute.xlu0 %1347 }
 0x2a8   : > { %v1394_v61 = vsel %vm1391_vm3, %v1082_v55, %v1348_v58 }
 0x2a9   : > { %v1408_v0 = vcombine.low %v1392_v59, %v1394_v61  ;;  %v1350_v2 = vpop.permute.xlu1 %1349 }
 0x2aa   : > { %v1395_v3 = vsel %vm1391_vm3, %v1100_v29, %v1350_v2 }
 0x2ab   : > { %v1416_v4 = vcombine.low %v1393_v39, %v1395_v3  ;;  %v1352_v25 = vpop.permute.xlu0 %1351  ;;  %v1415_v5 = vrot.slane %v1408_v0, %v5260_v42 }
 0x2ac   : > { %v1396_v9 = vsel %vm1391_vm3, %v1091_v27, %v1352_v25 }
 0x2ad   : > { %v1423_v62 = vrot.slane %v1416_v4, %v5260_v42  ;;  %v1354_v30 = vpop.permute.xlu1 %1353 }
 0x2ae   : > { %v1397_v26 = vsel %vm1391_vm3, %v1101_v10, %v1354_v30 }
 0x2af   : > { %v1440_v6 = vcombine.low %v1415_v5, %v1423_v62  ;;  %v1441_v7 = vcombine.high %v1415_v5, %v1423_v62  ;;  %v1356_v8 = vpop.permute.xlu0 %1355 }
 0x2b0   : > { %v1398_v11 = vsel %vm1391_vm3, %v1098_v40, %v1356_v8 }
 0x2b1   : > { %v1424_v12 = vcombine.low %v1396_v9, %v1398_v11  ;;  %v1358_v15 = vpop.permute.xlu1 %1357  ;;  %v1448_v23 = vrot.slane %v1440_v6, %v5267_v56  ;;  %v1455_v31 = vrot.slane %v1441_v7, %v5267_v56 }
 0x2b2   : > { %v1399_v28 = vsel %vm1391_vm3, %v1102_v41, %v1358_v15 }
 0x2b3   : > { %v1432_v43 = vcombine.low %v1397_v26, %v1399_v28  ;;  %v1360_v13 = vpop.permute.xlu0 %1359  ;;  %v1431_v18 = vrot.slane %v1424_v12, %v5260_v42 }
 0x2b4   : > { %v1400_v44 = vsel %vm1391_vm3, %v1143_v16, %v1360_v13 }
 0x2b5   : > { %v1439_v19 = vrot.slane %v1432_v43, %v5260_v42  ;;  %v1362_v20 = vpop.permute.xlu1 %1361 }
 0x2b6   : > { %v1401_v48 = vsel %vm1391_vm3, %v1167_v22, %v1362_v20 }
 0x2b7   : > { %v1456_v63 = vcombine.low %v1431_v18, %v1439_v19  ;;  %v1457_v21 = vcombine.high %v1431_v18, %v1439_v19  ;;  %v1364_v24 = vpop.permute.xlu0 %1363 }
 0x2b8   : > { %v1402_v35 = vsel %vm1391_vm3, %v1150_v17, %v1364_v24 }
 0x2b9   : > { %v1464_v33 = vrot.slane %v1456_v63, %v5267_v56  ;;  %v1471_v45 = vrot.slane %v1457_v21, %v5267_v56  ;;  %v1476_v37 = vcombine.low %v1400_v44, %v1402_v35  ;;  %v1366_v38 = vpop.permute.xlu1 %1365 }
 0x2ba   : > { %v1403_v49 = vsel %vm1391_vm3, %v1168_v36, %v1366_v38 }
 0x2bb   : > { %v1472_v52 = vcombine.low %v1448_v23, %v1464_v33  ;;  %v1473_v53 = vcombine.high %v1448_v23, %v1464_v33  ;;  %v1474_v14 = vcombine.low %v1455_v31, %v1471_v45  ;;  %v1475_v54 = vcombine.high %v1455_v31, %v1471_v45  ;;  %v1368_v55 = vpop.permute.xlu0 %1367 }
 0x2bc   : > { %v1484_v57 = vcombine.low %v1401_v48, %v1403_v49  ;;  %v1483_v0 = vrot.slane %v1476_v37, %v5260_v42  ;;  %v1404_v3 = vsel %vm1391_vm3, %v1159_v50, %v1368_v55 }
 0x2bd   : > { %v3998_v58 = vpack.c.bf16 %v1472_v52, %v1472_v52  ;;  %v4000_v59 = vpack.c.bf16 %v1473_v53, %v1473_v53  ;;  %v4002_v60 = vpack.c.bf16 %v1474_v14, %v1474_v14  ;;  %v4004_v61 = vpack.c.bf16 %v1475_v54, %v1475_v54  ;;  %v1370_v29 = vpop.permute.xlu1 %1369 }
 0x2be   : > { %v1491_v46 = vrot.slane %v1484_v57, %v5260_v42  ;;  %v1405_v40 = vsel %vm1391_vm3, %v1169_v32, %v1370_v29 }
 0x2bf   : > { %1577 = vst.msk [vmem:[#allocation2] sm:$0xf] %vm1576_vm4, %v3998_v58  ;;  %1579 = vst.msk [vmem:[#allocation2 + $0x8] sm:$0xf] %vm1576_vm4, %v4000_v59  ;;  %v1372_v34 = vpop.permute.xlu0 %1371 }
 0x2c0   : > { %1581 = vst.msk [vmem:[#allocation2 + $0x10] sm:$0xf] %vm1576_vm4, %v4002_v60  ;;  %1583 = vst.msk [vmem:[#allocation2 + $0x18] sm:$0xf] %vm1576_vm4, %v4004_v61  ;;  %v1508_v2 = vcombine.low %v1483_v0, %v1491_v46  ;;  %v1509_v39 = vcombine.high %v1483_v0, %v1491_v46  ;;  %v1406_v4 = vsel %vm1391_vm3, %v1166_v51, %v1372_v34 }
 0x2c1   : > { %v1492_v25 = vcombine.low %v1404_v3, %v1406_v4  ;;  %v1374_v27 = vpop.permute.xlu1 %1373 }
 0x2c2   : > { %v1407_v5 = vsel %vm1391_vm3, %v1170_v47, %v1374_v27  ;;  %v1516_v1 = vrot.slane %v1508_v2, %v5267_v56  ;;  %v1523_v9 = vrot.slane %v1509_v39, %v5267_v56 }
 0x2c3   : > { %v1500_v62 = vcombine.low %v1405_v40, %v1407_v5  ;;  %v1499_v30 = vrot.slane %v1492_v25, %v5260_v42 }
 0x2c5   : > { %v1507_v6 = vrot.slane %v1500_v62, %v5260_v42 }
 0x2c7   : > { %v1524_v7 = vcombine.low %v1499_v30, %v1507_v6  ;;  %v1525_v8 = vcombine.high %v1499_v30, %v1507_v6 }
 0x2c9   : > { %v1532_v10 = vrot.slane %v1524_v7, %v5267_v56  ;;  %v1539_v11 = vrot.slane %v1525_v8, %v5267_v56 }
 0x2cb   : > { %v1540_v41 = vcombine.low %v1516_v1, %v1532_v10  ;;  %v1541_v12 = vcombine.high %v1516_v1, %v1532_v10  ;;  %v1542_v15 = vcombine.low %v1523_v9, %v1539_v11  ;;  %v1543_v26 = vcombine.high %v1523_v9, %v1539_v11 }
 0x2cd   : > { %v3999_v28 = vpack.c.bf16 %v1540_v41, %v1540_v41  ;;  %v4001_v43 = vpack.c.bf16 %v1541_v12, %v1541_v12  ;;  %v4003_v16 = vpack.c.bf16 %v1542_v15, %v1542_v15  ;;  %v4005_v13 = vpack.c.bf16 %v1543_v26, %v1543_v26 }
 0x2cf   : > { %1578 = vst.msk [vmem:[#allocation2 + $0x4] sm:$0xf] %vm1576_vm4, %v3999_v28  ;;  %1580 = vst.msk [vmem:[#allocation2 + $0xc] sm:$0xf] %vm1576_vm4, %v4001_v43 }
 0x2d0   : > { %1582 = vst.msk [vmem:[#allocation2 + $0x14] sm:$0xf] %vm1576_vm4, %v4003_v16  ;;  %1584 = vst.msk [vmem:[#allocation2 + $0x1c] sm:$0xf] %vm1576_vm4, %v4005_v13 }
 0x2d1 PF: > { %v4352_v42 = vld [vmem:[#allocation10 + $0x18] sm:$0xff]   ;;  %v4772_v56 = vmov 0.0   ;;  %v4353_v17 = vld [vmem:[#allocation10 + $0x10] sm:$0xff]   ;;  %vm4773_vm5 = vmmov 0   ;;  %v4355_v18 = vld [vmem:[#allocation10 + $0x8] sm:$0xff]   ;;  %vm1950_vm6 = vcmask 261120   ;;  %v2094_v52 = vlaneseq }
 0x2d2   : > { %4092 = vmatprep.subr.bf16.mxu1 %v4772_v56  ;;  %4084 = vmatprep.subr.bf16.mxu0 %v4772_v56  ;;  %v4354_v19 = vld [vmem:[%s5138_s10] sm:$0xff]   ;;  %v4356_v20 = vld [vmem:[#allocation10] sm:$0xff]   ;;  %s4774_s10 = smov 112   ;;  %s4776_s21 = smov 104   ;;  %v4777_v50 = vmov 1983009808  }
 0x2d3   : > { %4093 = vmatpush3.bf16.msra.mxu1 %v4352_v42  ;;  %4096 = vmatprep.mubr.msk.bf16.mxu1 %vm4773_vm5, %v4772_v56  ;;  %v4357_v63 = vld [vmem:[%s5181_s9] sm:$0xff]   ;;  %v3948_v21 = vld [vmem:[#allocation12 + $0x1] ss:$0 sm:$0xff]  ;;  %s4775_s9 = smov 120   ;;  %v3943_v37 = vld [vmem:[#allocation12] ss:$0 sm:$0xff]  ;;  %v2092_v51 = vunpack.c.l.s4 %v4777_v50 }
 0x2d4   : > { %4094 = vmatprep.subr.bf16.mxu1 %v4772_v56  ;;  %4088 = vmatprep.mubr.msk.bf16.mxu0 %vm4773_vm5, %v4772_v56  ;;  %v2095_v55 = vshrl.u32 %v2094_v52, 7  ;;  %v4778_v58 = vmov 1934713408   ;;  %s4779_s3 = smov 8   ;;  %vm2619_vm7 = vcmask 130048   ;;  %vm2445_vm8 = vcmask 64512  }
 0x2d5   : > { %4085 = vmatpush3.bf16.msra.mxu0 %v4355_v18  ;;  %v2093_v54 = vunpack.c.0.s8 %v2092_v51  ;;  %v2124_v59 = vunpack.c.l.s4 %v4778_v58  ;;  %vm2943_vm9 = vcmask 125952   ;;  %s5941_s18 = sld [smem:[#allocation30_spill]]  ;;  %s4782_s30 = smov 24   ;;  %vm3441_vm10 = vcmask 195584  }
 0x2d6   : > { %4086 = vmatprep.subr.bf16.mxu0 %v4772_v56  ;;  %s5942_s0 = sld [smem:[#allocation53_spill]]  ;;  %s3532_s2 = sshll.u32 %s5188_s7, 4  ;;  %s5742_s2 = int_to_ptr.vmem [resolvable:$true] %s3532_s2 }
 0x2d7   : > { %4095 = vmatpush3.bf16.msra.mxu1 %v4353_v17  ;;  %v5513_v60 = vsub.s32 %v2093_v54, %v2095_v55  ;;  %v2125_v0 = vunpack.c.0.s8 %v2124_v59  ;;  %s5944_s5 = sld [smem:[#allocation54_spill]]  ;;  %s3513_s29 = scalar_lea.sflag [#allocation6], %s5134_s16 }
 0x2d8   : > { %4106 = vmatprep.subr.bf16.mxu1 %v4772_v56  ;;  %s4614_s25 = scalar_lea.vmem %s5742_s2, 256  ;;  %s4783_s8 = smov [#allocation18]  }
 0x2d9   : > { %4087 = vmatpush3.bf16.msra.mxu0 %v4356_v20  ;;  %v5517_v3 = vsub.s32 %v2125_v0, %v2095_v55  ;;  %p4615_p10 = scmp.ne.s32.totalorder %s5742_s2, %s4614_s25 }
 0x2da   : > { %4097 = vmatmul.mubr.msk.bf16.vlgmr.msra.gmra.mxu1 %vm1950_vm6, %v4354_v19  ;;  %4100 = vmatprep.subr.bf16.mxu0 %v4772_v56 }
 0x2db   : > { %4108 = vmatprep.mubr.msk.bf16.mxu1 %vm4773_vm5, %v4772_v56  ;;  %s3988_s4 = sshll.u32 %s5941_s18, 2  ;;  %p4616_p12 = pnand %p4615_p10, %p5065_p13 }
 0x2dc   : > { %4089 = vmatmul.mubr.msk.bf16.vlgmr.msra.gmra.mxu0 %vm1950_vm6, %v4357_v63  ;;  %s3529_s24 = sadd.s32 %s3988_s4, %s5169_s13 }
 0x2dd   : > { %4102 = vmatprep.mubr.msk.bf16.mxu0 %vm4773_vm5, %v4772_v56  ;;  %s3989_s6 = sshll.u32 %s3529_s24, 7  ;;  %p4617_p4 = pneg %p4616_p12 }
 0x2de   : > { %s5740_s19 = scalar_lea.hbm %s5944_s5, %s3989_s6 }
 0x39a   : > { %v2062_v22 = vpop.f32.mrf.mxu1 }
 0x39b   : > { %v2063_v24 = vadd.f32 %v3948_v21, %v2062_v22 }
 0x39c   : > { %v4098_v23 = vpop.f32.mrf.mxu1  ;;  %v1988_v44 = vpop.f32.mrf.mxu0 }
 0x39d   : > { %2233 = vrot.lane.b32.xlu1 %v2063_v24, %s4774_s10  ;;  %2227 = vrot.lane.b32.xlu0 %v2063_v24, %s4775_s9  ;;  %v5502_v48 = vadd.f32 %v3943_v37, %v1988_v44  ;;  %v4358_v44 = vld [vmem:[#allocation2] sm:$0xff]  }
 0x39e   : > { %v2065_v35 = vpop.f32.mrf.mxu1  ;;  %v4090_v31 = vpop.f32.mrf.mxu0 }
 0x39f   : > { %v5498_v36 = vadd.f32 %v3948_v21, %v2065_v35  ;;  %v4359_v35 = vld [vmem:[#allocation2 + $0x8] sm:$0xff]  }
 0x3a0   : > { %v4099_v33 = vpop.f32.mrf.mxu1  ;;  %v1991_v45 = vpop.f32.mrf.mxu0 }
 0x3a1   : > { %2235 = vrot.lane.b32.xlu1 %v5498_v36, %s4774_s10  ;;  %2229 = vrot.lane.b32.xlu0 %v5498_v36, %s4775_s9  ;;  %v5505_v49 = vadd.f32 %v3943_v37, %v1991_v45  ;;  %v2624_v33 = vsel %vm2619_vm7, %v4358_v44, 0  ;;  %v2676_v45 = vsel %vm2619_vm7, %v4359_v35, 0 }
 0x3a2   : > { %v4091_v38 = vpop.f32.mrf.mxu0  ;;  %4101 = vmatpush3.bf16.xpose.msra.mxu0 %v2624_v33  ;;  %4107 = vmatpush3.bf16.xpose.msra.mxu1 %v2676_v45 }
 0x3a3   : > { %4112 = vmatprep.subr.bf16.mxu0 %v4772_v56  ;;  %4118 = vmatprep.subr.bf16.mxu1 %v4772_v56 }
 0x3a5   : > { %2241 = vrot.lane.b32.xlu1 %v5498_v36, %s4776_s21  ;;  %2239 = vrot.lane.b32.xlu0 %v2063_v24, %s4776_s21 }
 0x3a9   : > { %2071 = vrot.lane.b32.xlu0 %v5502_v48, %s4775_s9  ;;  %2073 = vrot.lane.b32.xlu1 %v5505_v49, %s4775_s9 }
 0x3ad   : > { %2077 = vrot.lane.b32.xlu0 %v5502_v48, %s4774_s10  ;;  %2079 = vrot.lane.b32.xlu1 %v5505_v49, %s4774_s10  ;;  %s4618_s10 = sshll.u32 %s4783_s8, 4  ;;  %s4619_s10 = int_to_ptr.vmem [resolvable:$false] %s4618_s10 }
 0x3ae   : > { %s4620_s9 = scalar_lea.vmem %s4619_s10, 512  ;;  %p4621_p6 = scmp.lt.s32.totalorder %s5742_s2, %s4619_s10 }
 0x3af   : > { %p4622_p1 = scmp.lt.s32.totalorder %s4620_s9, %s4614_s25 }
 0x3b1   : > { %2083 = vrot.lane.b32.xlu0 %v5502_v48, %s4776_s21  ;;  %2085 = vrot.lane.b32.xlu1 %v5505_v49, %s4776_s21  ;;  %p4623_p9 = por %p4622_p1, %p4621_p6 }
 0x3b3   : > { %p4624_p0 = pnand %p4623_p9, %p4617_p4 }
 0x40f   : > { %v2228_v53 = vpop.permute.xlu0 %2227  ;;  %v2234_v14 = vpop.permute.xlu1 %2233 }
 0x410   : > { %v2245_v61 = vcombine.low %v2063_v24, %v2234_v14  ;;  %v2246_v2 = vcombine.high %v2063_v24, %v2234_v14 }
 0x412   : > { %v2253_v39 = vrot.slane %v2245_v61, %v5513_v60  ;;  %v2260_v5 = vrot.slane %v2246_v2, %v5513_v60 }
 0x413   : > { %v2230_v57 = vpop.permute.xlu0 %2229  ;;  %v2236_v46 = vpop.permute.xlu1 %2235 }
 0x414   : > { %v2313_v1 = vcombine.low %v5498_v36, %v2236_v46  ;;  %v2314_v16 = vcombine.high %v5498_v36, %v2236_v46 }
 0x416   : > { %v2321_v12 = vrot.slane %v2313_v1, %v5513_v60  ;;  %v2328_v19 = vrot.slane %v2314_v16, %v5513_v60 }
 0x417   : > { %v2240_v29 = vpop.permute.xlu0 %2239  ;;  %v2242_v40 = vpop.permute.xlu1 %2241 }
 0x418   : > { %v2261_v32 = vcombine.low %v2228_v53, %v2240_v29  ;;  %v2262_v34 = vcombine.high %v2228_v53, %v2240_v29  ;;  %v2329_v30 = vcombine.low %v2230_v57, %v2242_v40  ;;  %v2330_v15 = vcombine.high %v2230_v57, %v2242_v40 }
 0x41a   : > { %v2269_v47 = vrot.slane %v2261_v32, %v5513_v60  ;;  %v2276_v4 = vrot.slane %v2262_v34, %v5513_v60  ;;  %v2337_v9 = vrot.slane %v2329_v30, %v5513_v60  ;;  %v2344_v13 = vrot.slane %v2330_v15, %v5513_v60 }
 0x41b   : > { %v2072_v38 = vpop.permute.xlu0 %2071  ;;  %v2074_v50 = vpop.permute.xlu1 %2073 }
 0x41c   : > { %v2277_v25 = vcombine.low %v2253_v39, %v2269_v47  ;;  %v2278_v27 = vcombine.high %v2253_v39, %v2269_v47  ;;  %v2293_v6 = vcombine.low %v2260_v5, %v2276_v4  ;;  %v2294_v10 = vcombine.high %v2260_v5, %v2276_v4 }
 0x41d   : > { %v2345_v26 = vcombine.low %v2321_v12, %v2337_v9  ;;  %v2346_v42 = vcombine.high %v2321_v12, %v2337_v9  ;;  %v2361_v20 = vcombine.low %v2328_v19, %v2344_v13  ;;  %v2362_v22 = vcombine.high %v2328_v19, %v2344_v13 }
 0x41e   : > { %v2285_v62 = vrot.slane %v2277_v25, %v5517_v3  ;;  %v2292_v8 = vrot.slane %v2278_v27, %v5517_v3  ;;  %v2301_v41 = vrot.slane %v2293_v6, %v5517_v3  ;;  %v2308_v43 = vrot.slane %v2294_v10, %v5517_v3 }
 0x41f   : > { %v2353_v18 = vrot.slane %v2345_v26, %v5517_v3  ;;  %v2360_v21 = vrot.slane %v2346_v42, %v5517_v3  ;;  %v2369_v23 = vrot.slane %v2361_v20, %v5517_v3  ;;  %v2376_v31 = vrot.slane %v2362_v22, %v5517_v3  ;;  %v2078_v51 = vpop.permute.xlu0 %2077  ;;  %v2080_v52 = vpop.permute.xlu1 %2079 }
 0x420   : > { %2397 = vrot.lane.b32.xlu0 %v2285_v62, %s4779_s3  ;;  %v2309_v7 = vcombine.high %v2285_v62, %v4772_v56  ;;  %v2310_v11 = vcombine.high %v2292_v8, %v4772_v56  ;;  %v2311_v28 = vcombine.high %v2301_v41, %v4772_v56  ;;  %v2312_v17 = vcombine.high %v2308_v43, %v4772_v56 }
 0x421   : > { %v2377_v63 = vcombine.high %v2353_v18, %v4772_v56  ;;  %v2378_v24 = vcombine.high %v2360_v21, %v4772_v56  ;;  %v2379_v36 = vcombine.high %v2369_v23, %v4772_v56  ;;  %v2380_v37 = vcombine.high %v2376_v31, %v4772_v56 }
 0x422   : > { %2399 = vrot.lane.b32.xlu1 %v2309_v7, %s4779_s3  ;;  %v2090_v58 = vcombine.high %v5502_v48, %v2078_v51  ;;  %v2089_v0 = vcombine.low %v5502_v48, %v2078_v51  ;;  %v2157_v34 = vcombine.low %v5505_v49, %v2080_v52  ;;  %v2158_v7 = vcombine.high %v5505_v49, %v2080_v52 }
 0x423   : > { %v2084_v53 = vpop.permute.xlu0 %2083  ;;  %v2086_v14 = vpop.permute.xlu1 %2085 }
 0x424   : > { %2401 = vrot.lane.b32.xlu0 %v2292_v8, %s4779_s3  ;;  %v2106_v55 = vcombine.high %v2072_v38, %v2084_v53  ;;  %v2105_v59 = vcombine.low %v2072_v38, %v2084_v53  ;;  %v2173_v29 = vcombine.low %v2074_v50, %v2086_v14  ;;  %v2104_v47 = vrot.slane %v2090_v58, %v5513_v60 }
 0x425   : > { %v2097_v25 = vrot.slane %v2089_v0, %v5513_v60  ;;  %v2165_v5 = vrot.slane %v2157_v34, %v5513_v60  ;;  %v2174_v62 = vcombine.high %v2074_v50, %v2086_v14 }
 0x426   : > { %2403 = vrot.lane.b32.xlu1 %v2310_v11, %s4779_s3  ;;  %v2120_v46 = vrot.slane %v2106_v55, %v5513_v60  ;;  %v2113_v2 = vrot.slane %v2105_v59, %v5513_v60  ;;  %v2181_v4 = vrot.slane %v2173_v29, %v5513_v60 }
 0x427   : > { %v2188_v11 = vrot.slane %v2174_v62, %v5513_v60 }
 0x428   : > { %2405 = vrot.lane.b32.xlu0 %v2301_v41, %s4779_s3  ;;  %v2138_v27 = vcombine.high %v2104_v47, %v2120_v46  ;;  %v2122_v48 = vcombine.high %v2097_v25, %v2113_v2  ;;  %v2137_v30 = vcombine.low %v2104_v47, %v2120_v46  ;;  %v2190_v8 = vcombine.high %v2165_v5, %v2181_v4 }
 0x429   : > { %v2121_v1 = vcombine.low %v2097_v25, %v2113_v2  ;;  %v2189_v41 = vcombine.low %v2165_v5, %v2181_v4 }
 0x42a   : > { %2407 = vrot.lane.b32.xlu1 %v2311_v28, %s4779_s3  ;;  %v2152_v9 = vrot.slane %v2138_v27, %v5517_v3  ;;  %v2136_v12 = vrot.slane %v2122_v48, %v5517_v3  ;;  %v2145_v15 = vrot.slane %v2137_v30, %v5517_v3  ;;  %v2172_v28 = vrot.slane %v2158_v7, %v5513_v60 }
 0x42b   : > { %v2129_v16 = vrot.slane %v2121_v1, %v5517_v3 }
 0x42c   : > { %2409 = vrot.lane.b32.xlu0 %v2308_v43, %s4779_s3  ;;  %v2204_v43 = vrot.slane %v2190_v8, %v5517_v3  ;;  %v2156_v49 = vcombine.high %v2152_v9, %v4772_v56  ;;  %v2205_v42 = vcombine.low %v2172_v28, %v2188_v11  ;;  %v2154_v19 = vcombine.high %v2136_v12, %v4772_v56 }
 0x42d   : > { %v2155_v20 = vcombine.high %v2145_v15, %v4772_v56 }
 0x42e   : > { %2411 = vrot.lane.b32.xlu1 %v2312_v17, %s4779_s3  ;;  %v2197_v17 = vrot.slane %v2189_v41, %v5517_v3  ;;  %v2222_v22 = vcombine.high %v2204_v43, %v4772_v56 }
 0x430   : > { %2413 = vrot.lane.b32.xlu0 %v2353_v18, %s4779_s3  ;;  %v2206_v18 = vcombine.high %v2172_v28, %v2188_v11  ;;  %v2221_v33 = vcombine.high %v2197_v17, %v4772_v56  ;;  %v4360_v28 = vld [vmem:[#allocation2 + $0x10] sm:$0xff]  }
 0x432   : > { %2415 = vrot.lane.b32.xlu1 %v2377_v63, %s4779_s3  ;;  %v2220_v53 = vrot.slane %v2206_v18, %v5517_v3 }
 0x434   : > { %2417 = vrot.lane.b32.xlu0 %v2360_v21, %s4779_s3 }
 0x436   : > { %2419 = vrot.lane.b32.xlu1 %v2378_v24, %s4779_s3  ;;  %v2153_v24 = vcombine.high %v2129_v16, %v4772_v56 }
 0x438   : > { %2421 = vrot.lane.b32.xlu0 %v2369_v23, %s4779_s3 }
 0x43a   : > { %2423 = vrot.lane.b32.xlu1 %v2379_v36, %s4779_s3 }
 0x43c   : > { %2425 = vrot.lane.b32.xlu0 %v2376_v31, %s4779_s3 }
 0x43e   : > { %2427 = vrot.lane.b32.xlu1 %v2380_v37, %s4779_s3  ;;  %v2213_v37 = vrot.slane %v2205_v42, %v5517_v3 }
 0x440   : > { %v2223_v47 = vcombine.high %v2213_v37, %v4772_v56 }
 0x492   : > { %v5563_v54 = vpop.permute.xlu0 %2397 }
 0x493   : > { %v2446_v29 = vsel %vm2445_vm8, %v2129_v16, %v5563_v54 }
 0x494   : > { %v2400_v57 = vpop.permute.xlu1 %2399 }
 0x495   : > { %v2447_v38 = vsel %vm2445_vm8, %v2153_v24, %v2400_v57 }
 0x496   : > { %v2402_v61 = vpop.permute.xlu0 %2401 }
 0x497   : > { %v2448_v50 = vsel %vm2445_vm8, %v2136_v12, %v2402_v61 }
 0x498   : > { %v2404_v32 = vpop.permute.xlu1 %2403 }
 0x499   : > { %v2449_v23 = vsel %vm2445_vm8, %v2154_v19, %v2404_v32  ;;  %v2462_v32 = vcombine.low %v2446_v29, %v2448_v50 }
 0x49a   : > { %v2406_v39 = vpop.permute.xlu0 %2405  ;;  %v2470_v14 = vcombine.low %v2447_v38, %v2449_v23 }
 0x49b   : > { %v2450_v51 = vsel %vm2445_vm8, %v2145_v15, %v2406_v39  ;;  %v2224_v39 = vcombine.high %v2220_v53, %v4772_v56  ;;  %v2469_v48 = vrot.slane %v2462_v32, %v5513_v60 }
 0x49c   : > { %v2408_v40 = vpop.permute.xlu1 %2407  ;;  %v2477_v4 = vrot.slane %v2470_v14, %v5513_v60 }
 0x49d   : > { %v2451_v44 = vsel %vm2445_vm8, %v2155_v20, %v2408_v40 }
 0x49e   : > { %v2410_v6 = vpop.permute.xlu0 %2409  ;;  %v2495_v24 = vcombine.high %v2469_v48, %v2477_v4 }
 0x49f   : > { %v2452_v35 = vsel %vm2445_vm8, %v2152_v9, %v2410_v6  ;;  %v2494_v9 = vcombine.low %v2469_v48, %v2477_v4 }
 0x4a0   : > { %v2412_v10 = vpop.permute.xlu1 %2411  ;;  %v2478_v55 = vcombine.low %v2450_v51, %v2452_v35 }
 0x4a1   : > { %v2453_v63 = vsel %vm2445_vm8, %v2156_v49, %v2412_v10 }
 0x4a2   : > { %v2414_v26 = vpop.permute.xlu0 %2413  ;;  %v2486_v31 = vcombine.low %v2451_v44, %v2453_v63  ;;  %v2485_v25 = vrot.slane %v2478_v55, %v5513_v60 }
 0x4a3   : > { %v2454_v61 = vsel %vm2445_vm8, %v2197_v17, %v2414_v26  ;;  %v2502_v26 = vrot.slane %v2494_v9, %v5517_v3 }
 0x4a4   : > { %v2416_v13 = vpop.permute.xlu1 %2415  ;;  %v2493_v57 = vrot.slane %v2486_v31, %v5513_v60 }
 0x4a5   : > { %v2455_v58 = vsel %vm2445_vm8, %v2221_v33, %v2416_v13  ;;  %v2509_v33 = vrot.slane %v2495_v24, %v5517_v3 }
 0x4a6   : > { %v2418_v21 = vpop.permute.xlu0 %2417  ;;  %v2510_v30 = vcombine.low %v2485_v25, %v2493_v57  ;;  %v2511_v42 = vcombine.high %v2485_v25, %v2493_v57 }
 0x4a7   : > { %v2456_v59 = vsel %vm2445_vm8, %v2204_v43, %v2418_v21  ;;  %v4361_v43 = vld [vmem:[#allocation2 + $0x18] sm:$0xff]   ;;  %v2728_v21 = vsel %vm2619_vm7, %v4360_v28, 0 }
 0x4a8   : > { %v2420_v36 = vpop.permute.xlu1 %2419  ;;  %v2530_v34 = vcombine.low %v2454_v61, %v2456_v59  ;;  %v2518_v12 = vrot.slane %v2510_v30, %v5517_v3 }
 0x4a9   : > { %v2457_v45 = vsel %vm2445_vm8, %v2222_v22, %v2420_v36  ;;  %v2780_v22 = vsel %vm2619_vm7, %v4361_v43, 0  ;;  %v2525_v36 = vrot.slane %v2511_v42, %v5517_v3 }
 0x4aa   : > { %v2422_v52 = vpop.permute.xlu0 %2421  ;;  %v2538_v0 = vcombine.low %v2455_v58, %v2457_v45  ;;  %v2537_v8 = vrot.slane %v2530_v34, %v5513_v60  ;;  %v2526_v17 = vcombine.low %v2502_v26, %v2518_v12  ;;  %v2527_v18 = vcombine.high %v2502_v26, %v2518_v12 }
 0x4ab   : > { %v2458_v27 = vsel %vm2445_vm8, %v2213_v37, %v2422_v52  ;;  %v2528_v38 = vcombine.low %v2509_v33, %v2525_v36  ;;  %v2529_v50 = vcombine.high %v2509_v33, %v2525_v36 }
 0x4ac   : > { %v2424_v46 = vpop.permute.xlu1 %2423  ;;  %v2545_v40 = vrot.slane %v2538_v0, %v5513_v60 }
 0x4ad   : > { %v2459_v6 = vsel %vm2445_vm8, %v2223_v47, %v2424_v46 }
 0x4ae   : > { %v2426_v2 = vpop.permute.xlu0 %2425  ;;  %v2562_v10 = vcombine.low %v2537_v8, %v2545_v40  ;;  %v2563_v19 = vcombine.high %v2537_v8, %v2545_v40 }
 0x4af   : > { %v2460_v54 = vsel %vm2445_vm8, %v2220_v53, %v2426_v2  ;;  %v4023_v53 = vld [vmem:[%s5186_s26] sm:$0xff]   ;;  %s4781_s26 = smov 16  }
 0x4b0   : > { %v2546_v5 = vcombine.low %v2458_v27, %v2460_v54  ;;  %v2428_v62 = vpop.permute.xlu1 %2427  ;;  %v2570_v16 = vrot.slane %v2562_v10, %v5517_v3  ;;  %v2577_v31 = vrot.slane %v2563_v19, %v5517_v3  ;;  %v4024_v14 = vunpack.c.l.bf16 %v4023_v53 }
 0x4b1   : > { %v2461_v7 = vsel %vm2445_vm8, %v2224_v39, %v2428_v62  ;;  %v4025_v29 = vunpack.c.h.bf16 %v4023_v53 }
 0x4b2   : > { %v2554_v1 = vcombine.low %v2459_v6, %v2461_v7  ;;  %v2553_v11 = vrot.slane %v2546_v5, %v5513_v60 }
 0x4b4   : > { %v2561_v41 = vrot.slane %v2554_v1, %v5513_v60 }
 0x4b6   : > { %v2578_v15 = vcombine.low %v2553_v11, %v2561_v41  ;;  %v2579_v49 = vcombine.high %v2553_v11, %v2561_v41 }
 0x4b8   : > { %v2586_v13 = vrot.slane %v2578_v15, %v5517_v3  ;;  %v2593_v23 = vrot.slane %v2579_v49, %v5517_v3 }
 0x4ba   : > { %v2594_v20 = vcombine.low %v2570_v16, %v2586_v13  ;;  %v2595_v63 = vcombine.high %v2570_v16, %v2586_v13  ;;  %v2596_v45 = vcombine.low %v2577_v31, %v2593_v23  ;;  %v2597_v37 = vcombine.high %v2577_v31, %v2593_v23 }
 0x4bc   : > { %v2598_v44 = vpack.c.bf16 %v2594_v20, %v2526_v17  ;;  %v2599_v35 = vpack.c.bf16 %v2595_v63, %v2527_v18  ;;  %v2600_v51 = vpack.c.bf16 %v2596_v45, %v2528_v38  ;;  %v2601_v52 = vpack.c.bf16 %v2597_v37, %v2529_v50 }
 0x4be   : > { %4103 = vmatmul.mubr.msk.bf16.vlgmr.msra.gmra.mxu0 %vm2619_vm7, %v2598_v44  ;;  %4109 = vmatmul.mubr.msk.bf16.vlgmr.msra.gmra.mxu1 %vm2619_vm7, %v2599_v35 }
 0x4bf   : > { %4113 = vmatpush3.bf16.xpose.msra.mxu0 %v2728_v21  ;;  %4119 = vmatpush3.bf16.xpose.msra.mxu1 %v2780_v22 }
 0x4c0   : > { %4114 = vmatprep.mubr.msk.bf16.mxu0 %vm4773_vm5, %v4772_v56  ;;  %4120 = vmatprep.mubr.msk.bf16.mxu1 %vm4773_vm5, %v4772_v56 }
 0x4c1   : > { %4124 = vmatprep.subr.bf16.mxu0 %v4772_v56  ;;  %4130 = vmatprep.subr.bf16.mxu1 %v4772_v56 }
 0x4c6   : > { %4115 = vmatmul.mubr.msk.bf16.vlgmr.msra.gmra.mxu0 %vm2619_vm7, %v2600_v51  ;;  %4121 = vmatmul.mubr.msk.bf16.vlgmr.msra.gmra.mxu1 %vm2619_vm7, %v2601_v52 }
 0x4c7   : > { %4126 = vmatprep.mubr.msk.bf16.mxu0 %vm4773_vm5, %v4772_v56  ;;  %4132 = vmatprep.mubr.msk.bf16.mxu1 %vm4773_vm5, %v4772_v56 }
 0x57e   : > { %v2660_v55 = vpop.f32.mrf.mxu0  ;;  %v2712_v58 = vpop.f32.mrf.mxu1 }
 0x57f   : > { %v2661_v59 = vadd.f32 %v4024_v14, %v2660_v55  ;;  %v2713_v32 = vadd.f32 %v4024_v14, %v2712_v58 }
 0x580   : > { %v4104_v0 = vpop.f32.mrf.mxu0  ;;  %v4110_v46 = vpop.f32.mrf.mxu1 }
 0x581   : > { %v2823_v57 = vsel %vm2619_vm7, %v2661_v59, -inf  ;;  %v2829_v25 = vsel %vm2619_vm7, %v2713_v32, -inf }
 0x582   : > { %v2715_v61 = vpop.f32.mrf.mxu1  ;;  %2824 = vmax.xlane.f32.xlu0 %v2823_v57  ;;  %v2663_v34 = vpop.f32.mrf.mxu0 }
 0x583   : > { %v2664_v47 = vadd.f32 %v4025_v29, %v2663_v34  ;;  %v2716_v4 = vadd.f32 %v4025_v29, %v2715_v61 }
 0x584   : > { %v4105_v2 = vpop.f32.mrf.mxu0  ;;  %v4111_v39 = vpop.f32.mrf.mxu1 }
 0x585   : > { %v2826_v27 = vsel %vm2619_vm7, %v2664_v47, -inf  ;;  %v2832_v6 = vsel %vm2619_vm7, %v2716_v4, -inf  ;;  %v4362_v39 = vld [vmem:[#allocation3] sm:$0xff]  }
 0x586   : > { %v2816_v54 = vpop.f32.mrf.mxu1  ;;  %2830 = vmax.xlane.f32.xlu0 %v2829_v25  ;;  %2827 = vmax.xlane.f32.xlu1 %v2826_v27  ;;  %v2764_v40 = vpop.f32.mrf.mxu0 }
 0x587   : > { %v2765_v5 = vadd.f32 %v4024_v14, %v2764_v40  ;;  %v2817_v30 = vadd.f32 %v4024_v14, %v2816_v54  ;;  %4125 = vmatpush3.bf16.msra.mxu0 %v4362_v39 }
 0x588   : > { %v4116_v62 = vpop.f32.mrf.mxu0  ;;  %v4122_v48 = vpop.f32.mrf.mxu1  ;;  %4136 = vmatprep.subr.bf16.mxu0 %v4772_v56 }
 0x589   : > { %v2835_v7 = vsel %vm2619_vm7, %v2765_v5, -inf  ;;  %v2841_v12 = vsel %vm2619_vm7, %v2817_v30, -inf }
 0x58a   : > { %v2819_v8 = vpop.f32.mrf.mxu1  ;;  %2833 = vmax.xlane.f32.xlu0 %v2832_v6  ;;  %2836 = vmax.xlane.f32.xlu1 %v2835_v7  ;;  %v2767_v1 = vpop.f32.mrf.mxu0 }
 0x58b   : > { %v2768_v9 = vadd.f32 %v4025_v29, %v2767_v1  ;;  %v2820_v41 = vadd.f32 %v4025_v29, %v2819_v8 }
 0x58c   : > { %v4117_v10 = vpop.f32.mrf.mxu0  ;;  %v4123_v11 = vpop.f32.mrf.mxu1 }
 0x58d   : > { %v2838_v15 = vsel %vm2619_vm7, %v2768_v9, -inf  ;;  %v2844_v26 = vsel %vm2619_vm7, %v2820_v41, -inf }
 0x58e   : > { %2842 = vmax.xlane.f32.xlu1 %v2841_v12  ;;  %2839 = vmax.xlane.f32.xlu0 %v2838_v15  ;;  %v4364_v12 = vld [vmem:[#allocation3 + $0x10] sm:$0xff]  }
 0x592   : > { %2845 = vmax.xlane.f32.xlu0 %v2844_v26 }
 0x60b   : > { %v2825_v28 = vpop.xlane.xlu0 %2824 }
 0x60c   : > { %v2847_v43 = vsub.f32 %v2661_v59, %v2825_v28 }
 0x60e   : > { %v2855_v16 = vmul.f32 1.442695, %v2847_v43 }
 0x60f   : > { %v2831_v49 = vpop.xlane.xlu0 %2830  ;;  %v2828_v13 = vpop.xlane.xlu1 %2827 }
 0x610   : > { %4368 = vpow2.f32 %v2855_v16  ;;  %v2849_v42 = vsub.f32 %v2713_v32, %v2831_v49  ;;  %v2848_v17 = vsub.f32 %v2664_v47, %v2828_v13  ;;  %v4365_v13 = vld [vmem:[#allocation3 + $0x18] sm:$0xff]  }
 0x612   : > { %v2859_v18 = vmul.f32 1.442695, %v2849_v42  ;;  %v2857_v19 = vmul.f32 1.442695, %v2848_v17 }
 0x613   : > { %v2834_v20 = vpop.xlane.xlu0 %2833  ;;  %v2837_v63 = vpop.xlane.xlu1 %2836 }
 0x614   : > { %4370 = vpow2.f32 %v2859_v18  ;;  %v2850_v21 = vsub.f32 %v2716_v4, %v2834_v20  ;;  %v2851_v22 = vsub.f32 %v2765_v5, %v2837_v63  ;;  %v4363_v4 = vld [vmem:[#allocation3 + $0x8] sm:$0xff]  }
 0x615   : > { %4372 = vpow2.f32 %v2857_v19  ;;  %4131 = vmatpush3.bf16.msra.mxu1 %v4363_v4 }
 0x616   : > { %v2861_v24 = vmul.f32 1.442695, %v2850_v21  ;;  %v2863_v23 = vmul.f32 1.442695, %v2851_v22  ;;  %4142 = vmatprep.subr.bf16.mxu1 %v4772_v56 }
 0x617   : > { %v2843_v44 = vpop.xlane.xlu1 %2842  ;;  %v2840_v35 = vpop.xlane.xlu0 %2839 }
 0x618   : > { %4374 = vpow2.f32 %v2861_v24  ;;  %v2853_v36 = vsub.f32 %v2817_v30, %v2843_v44  ;;  %v2852_v31 = vsub.f32 %v2768_v9, %v2840_v35 }
 0x619   : > { %4376 = vpow2.f32 %v2863_v23 }
 0x61a   : > { %v2867_v33 = vmul.f32 1.442695, %v2853_v36  ;;  %v2865_v45 = vmul.f32 1.442695, %v2852_v31 }
 0x61b   : > { %v2846_v37 = vpop.xlane.xlu0 %2845 }
 0x61c   : > { %4378 = vpow2.f32 %v2867_v33  ;;  %v2854_v38 = vsub.f32 %v2820_v41, %v2846_v37  ;;  %v4366_v33 = vld [vmem:[#allocation16 + $0x8] sm:$0xff]  }
 0x61d   : > { %v4369_v50 = vpop.eup %4368  ;;  %4380 = vpow2.f32 %v2865_v45 }
 0x61e   : > { %v2869_v51 = vmul.f32 1.442695, %v2854_v38  ;;  %v2871_v52 = vsel %vm2619_vm7, %v4369_v50, 0.0 }
 0x61f   : > { %2872 = vadd.xlane.f32.xlu1 %v2871_v52 }
 0x620   : > { %4382 = vpow2.f32 %v2869_v51 }
 0x621   : > { %v4371_v53 = vpop.eup %4370 }
 0x622   : > { %v4373_v14 = vpop.eup %4372  ;;  %v2877_v55 = vsel %vm2619_vm7, %v4371_v53, 0.0 }
 0x623   : > { %2878 = vadd.xlane.f32.xlu1 %v2877_v55  ;;  %v2874_v58 = vsel %vm2619_vm7, %v4373_v14, 0.0 }
 0x624   : > { %2875 = vadd.xlane.f32.xlu0 %v2874_v58 }
 0x625   : > { %v4375_v59 = vpop.eup %4374 }
 0x626   : > { %v4377_v29 = vpop.eup %4376  ;;  %v2880_v0 = vsel %vm2619_vm7, %v4375_v59, 0.0 }
 0x627   : > { %v2883_v46 = vsel %vm2619_vm7, %v4377_v29, 0.0 }
 0x628   : > { %2884 = vadd.xlane.f32.xlu1 %v2883_v46  ;;  %2881 = vadd.xlane.f32.xlu0 %v2880_v0 }
 0x629   : > { %v4379_v32 = vpop.eup %4378 }
 0x62a   : > { %v5656_v57 = vpop.eup %4380  ;;  %v2889_v61 = vsel %vm2619_vm7, %v4379_v32, 0.0 }
 0x62b   : > { %v2886_v34 = vsel %vm2619_vm7, %v5656_v57, 0.0 }
 0x62c   : > { %2890 = vadd.xlane.f32.xlu1 %v2889_v61  ;;  %2887 = vadd.xlane.f32.xlu0 %v2886_v34  ;;  %v4780_v61 = vmov 0  }
 0x62d   : > { %v5661_v47 = vpop.eup %4382  ;;  %v3181_v34 = vpack.i.b16 %v4780_v61, %v4780_v61 }
 0x62e   : > { %v2892_v2 = vsel %vm2619_vm7, %v5661_v47, 0.0 }
 0x630   : > { %2893 = vadd.xlane.f32.xlu0 %v2892_v2 }
 0x6a8   : > { %v2873_v25 = vpop.xlane.xlu1 %2872 }
 0x6a9   : > { %4384 = vrcp.f32 %v2873_v25 }
 0x6ac   : > { %v2879_v27 = vpop.xlane.xlu1 %2878 }
 0x6ad   : > { %4386 = vrcp.f32 %v2879_v27  ;;  %v2876_v54 = vpop.xlane.xlu0 %2875 }
 0x6ae   : > { %4388 = vrcp.f32 %v2876_v54 }
 0x6b1   : > { %v2885_v40 = vpop.xlane.xlu1 %2884  ;;  %v2882_v5 = vpop.xlane.xlu0 %2881 }
 0x6b2   : > { %4390 = vrcp.f32 %v2885_v40 }
 0x6b3   : > { %4392 = vrcp.f32 %v2882_v5 }
 0x6b5   : > { %v2891_v62 = vpop.xlane.xlu1 %2890  ;;  %v2888_v48 = vpop.xlane.xlu0 %2887 }
 0x6b6   : > { %v4385_v30 = vpop.eup %4384  ;;  %4394 = vrcp.f32 %v2891_v62 }
 0x6b7   : > { %4396 = vrcp.f32 %v2888_v48  ;;  %v2903_v6 = vmul.f32 %v4385_v30, %v4369_v50 }
 0x6b9   : > { %v2894_v7 = vpop.xlane.xlu0 %2893  ;;  %v4014_v8 = vpack.c.bf16 %v2903_v6, %v2903_v6 }
 0x6ba   : > { %v4387_v1 = vpop.eup %4386  ;;  %4398 = vrcp.f32 %v2894_v7 }
 0x6bb   : > { %v4389_v9 = vpop.eup %4388  ;;  %2944 = vst.msk [vmem:[%s5190_s23] sm:$0xf] %vm2943_vm9, %v4014_v8  ;;  %v2905_v10 = vmul.f32 %v4387_v1, %v4371_v53 }
 0x6bc   : > { %v2904_v11 = vmul.f32 %v4389_v9, %v4373_v14 }
 0x6bd   : > { %v4016_v41 = vpack.c.bf16 %v2905_v10, %v2905_v10 }
 0x6be   : > { %v2911_v15 = vpack.c.bf16 %v2904_v11, %v2903_v6  ;;  %v4015_v26 = vpack.c.bf16 %v2904_v11, %v2904_v11 }
 0x6bf   : > { %v4391_v28 = vpop.eup %4390  ;;  %2946 = vst.msk [vmem:[%s5190_s23 + $0x8] sm:$0xf] %vm2943_vm9, %v4016_v41 }
 0x6c0   : > { %v4393_v43 = vpop.eup %4392  ;;  %2945 = vst.msk [vmem:[%s5190_s23 + $0x4] sm:$0xf] %vm2943_vm9, %v4015_v26  ;;  %4127 = vmatmul.mubr.msk.bf16.vlgmr.msra.gmra.mxu0 %vm2619_vm7, %v2911_v15  ;;  %v2907_v16 = vmul.f32 %v4391_v28, %v4377_v29 }
 0x6c1   : > { %v2906_v49 = vmul.f32 %v4393_v43, %v4375_v59  ;;  %4137 = vmatpush3.bf16.msra.mxu0 %v4364_v12  ;;  %4138 = vmatprep.mubr.msk.bf16.mxu0 %vm4773_vm5, %v4772_v56 }
 0x6c2   : > { %v4018_v42 = vpack.c.bf16 %v2907_v16, %v2907_v16  ;;  %4148 = vmatprep.subr.bf16.mxu0 %v4772_v56 }
 0x6c3   : > { %v4395_v17 = vpop.eup %4394  ;;  %v2912_v18 = vpack.c.bf16 %v2906_v49, %v2905_v10  ;;  %v4017_v19 = vpack.c.bf16 %v2906_v49, %v2906_v49 }
 0x6c4   : > { %v4397_v20 = vpop.eup %4396  ;;  %2948 = vst.msk [vmem:[%s5190_s23 + $0x10] sm:$0xf] %vm2943_vm9, %v4018_v42  ;;  %v2909_v63 = vmul.f32 %v4395_v17, %v4379_v32 }
 0x6c5   : > { %2947 = vst.msk [vmem:[%s5190_s23 + $0xc] sm:$0xf] %vm2943_vm9, %v4017_v19  ;;  %4133 = vmatmul.mubr.msk.bf16.vlgmr.msra.gmra.mxu1 %vm2619_vm7, %v2912_v18  ;;  %v2908_v21 = vmul.f32 %v4397_v20, %v5656_v57 }
 0x6c6   : > { %4143 = vmatpush3.bf16.msra.mxu1 %v4365_v13  ;;  %4144 = vmatprep.mubr.msk.bf16.mxu1 %vm4773_vm5, %v4772_v56  ;;  %v4020_v22 = vpack.c.bf16 %v2909_v63, %v2909_v63 }
 0x6c7   : > { %v4399_v24 = vpop.eup %4398  ;;  %v2913_v23 = vpack.c.bf16 %v2908_v21, %v2907_v16  ;;  %v4019_v44 = vpack.c.bf16 %v2908_v21, %v2908_v21 }
 0x6c8   : > { %v2910_v35 = vmul.f32 %v4399_v24, %v5661_v47  ;;  %2950 = vst.msk [vmem:[%s5190_s23 + $0x18] sm:$0xf] %vm2943_vm9, %v4020_v22 }
 0x6c9   : > { %2949 = vst.msk [vmem:[%s5190_s23 + $0x14] sm:$0xf] %vm2943_vm9, %v4019_v44  ;;  %4139 = vmatmul.mubr.msk.bf16.vlgmr.msra.gmra.mxu0 %vm2619_vm7, %v2913_v23 }
 0x6ca   : > { %v2914_v36 = vpack.c.bf16 %v2910_v35, %v2909_v63  ;;  %v4021_v31 = vpack.c.bf16 %v2910_v35, %v2910_v35  ;;  %4152 = vmatprep.mubr.msk.bf16.mxu0 %vm4773_vm5, %v4772_v56  ;;  %4149 = vmatpush3.bf16.msra.mxu0 %v4366_v33 }
 0x6cb   : > { %4150 = vmatprep.subr.bf16.mxu0 %v4772_v56 }
 0x6cc   : > { %2951 = vst.msk [vmem:[%s5190_s23 + $0x1c] sm:$0xf] %vm2943_vm9, %v4021_v31 }
 0x6cd   : > { %4145 = vmatmul.mubr.msk.bf16.vlgmr.msra.gmra.mxu1 %vm2619_vm7, %v2914_v36 }
 0x780   : > { %v3003_v45 = vpop.f32.mrf.mxu0 }
 0x782   : > { %v4128_v37 = vpop.f32.mrf.mxu0 }
 0x784   : > { %v3006_v38 = vpop.f32.mrf.mxu0 }
 0x785   : > { %v3053_v50 = vpop.f32.mrf.mxu1  ;;  %v3160_v29 = vpack.c.bf16 %v3006_v38, %v3003_v45 }
 0x786   : > { %v4129_v51 = vpop.f32.mrf.mxu0 }
 0x787   : > { %v4134_v52 = vpop.f32.mrf.mxu1  ;;  %v3168_v39 = vshrl.u32 %v3160_v29, 16 }
 0x789   : > { %v3056_v53 = vpop.f32.mrf.mxu1  ;;  %v3103_v14 = vpop.f32.mrf.mxu0 }
 0x78a   : > { %v3161_v55 = vpack.c.bf16 %v3056_v53, %v3053_v50 }
 0x78b   : > { %v4135_v58 = vpop.f32.mrf.mxu1  ;;  %v4140_v59 = vpop.f32.mrf.mxu0 }
 0x78c   : > { %v3166_v32 = vpack.i.b16 %v3161_v55, %v3160_v29  ;;  %v3169_v57 = vshrl.u32 %v3161_v55, 16 }
 0x78d   : > { %v3106_v0 = vpop.f32.mrf.mxu0  ;;  %v3153_v46 = vpop.f32.mrf.mxu1 }
 0x78e   : > { %v3162_v2 = vpack.c.bf16 %v3106_v0, %v3103_v14  ;;  %v3170_v27 = vpack.i.b16 %v3169_v57, %v3168_v39  ;;  %v3186_v54 = vcombine.high %v3166_v32, %v3181_v34  ;;  %v3193_v30 = vrot.slane %v3166_v32, %v5513_v60  ;;  %v4367_v0 = vld [vmem:[#allocation16] sm:$0xff]  }
 0x78f   : > { %v4141_v47 = vpop.f32.mrf.mxu0  ;;  %v4146_v56 = vpop.f32.mrf.mxu1  ;;  %4151 = vmatpush3.bf16.msra.mxu0 %v4367_v0 }
 0x790   : > { %v3176_v5 = vshrl.u32 %v3162_v2, 16  ;;  %v3200_v1 = vrot.slane %v3186_v54, %v5513_v60  ;;  %v3252_v9 = vcombine.high %v3170_v27, %v3181_v34  ;;  %v3259_v15 = vrot.slane %v3170_v27, %v5513_v60 }
 0x791   : > { %v3156_v4 = vpop.f32.mrf.mxu1 }
 0x792   : > { %v3163_v25 = vpack.c.bf16 %v3156_v4, %v3153_v46  ;;  %v3266_v13 = vrot.slane %v3252_v9, %v5513_v60 }
 0x793   : > { %v4147_v40 = vpop.f32.mrf.mxu1 }
 0x794   : > { %v3174_v62 = vpack.i.b16 %v3163_v25, %v3162_v2  ;;  %v3177_v48 = vshrl.u32 %v3163_v25, 16 }
 0x796   : > { %v3178_v6 = vpack.i.b16 %v3177_v48, %v3176_v5  ;;  %v3201_v7 = vcombine.high %v3174_v62, %v3181_v34  ;;  %v3208_v8 = vrot.slane %v3174_v62, %v5513_v60 }
 0x798   : > { %v3215_v10 = vrot.slane %v3201_v7, %v5513_v60  ;;  %v3216_v11 = vcombine.low %v3193_v30, %v3208_v8  ;;  %v3217_v41 = vcombine.high %v3193_v30, %v3208_v8  ;;  %v3267_v12 = vcombine.high %v3178_v6, %v3181_v34 }
 0x799   : > { %v3274_v26 = vrot.slane %v3178_v6, %v5513_v60 }
 0x79a   : > { %v3224_v28 = vrot.slane %v3216_v11, %v5517_v3  ;;  %v3231_v43 = vrot.slane %v3217_v41, %v5517_v3  ;;  %v3232_v16 = vcombine.low %v3200_v1, %v3215_v10  ;;  %v3233_v49 = vcombine.high %v3200_v1, %v3215_v10  ;;  %v3981_v11 = vld [vmem:[%s5942_s0] ss:$0 sm:$0xff] }
 0x79b   : > { %v3281_v42 = vrot.slane %v3267_v12, %v5513_v60  ;;  %v3282_v17 = vcombine.low %v3259_v15, %v3274_v26  ;;  %v3283_v18 = vcombine.high %v3259_v15, %v3274_v26 }
 0x79c   : > { %v3240_v19 = vrot.slane %v3232_v16, %v5517_v3  ;;  %v3247_v20 = vrot.slane %v3233_v49, %v5517_v3  ;;  %v3318_v63 = vcombine.low %v3224_v28, %v3231_v43  ;;  %v3977_v21 = vcombine.high %v3224_v28, %v3231_v43 }
 0x79d   : > { %v3290_v22 = vrot.slane %v3282_v17, %v5517_v3  ;;  %v3297_v24 = vrot.slane %v3283_v18, %v5517_v3  ;;  %v3298_v23 = vcombine.low %v3266_v13, %v3281_v42  ;;  %v3299_v44 = vcombine.high %v3266_v13, %v3281_v42 }
 0x79e   : > { %v3334_v35 = vcombine.low %v3240_v19, %v3247_v20  ;;  %v3978_v36 = vcombine.high %v3240_v19, %v3247_v20  ;;  %v3325_v31 = vrot.slane %v3318_v63, %v5513_v60  ;;  %v3333_v33 = vrot.slane %v3977_v21, %v5513_v60 }
 0x79f   : > { %v3306_v45 = vrot.slane %v3298_v23, %v5517_v3  ;;  %v3313_v37 = vrot.slane %v3299_v44, %v5517_v3  ;;  %v3368_v38 = vcombine.low %v3290_v22, %v3297_v24  ;;  %v3979_v50 = vcombine.high %v3290_v22, %v3297_v24 }
 0x7a0   : > { %v3341_v51 = vrot.slane %v3334_v35, %v5513_v60  ;;  %v3349_v52 = vrot.slane %v3978_v36, %v5513_v60  ;;  %v3350_v53 = vcombine.low %v3325_v31, %v3333_v33 }
 0x7a1   : > { %v3375_v14 = vrot.slane %v3368_v38, %v5513_v60  ;;  %v3383_v55 = vrot.slane %v3979_v50, %v5513_v60  ;;  %v3384_v58 = vcombine.low %v3306_v45, %v3313_v37  ;;  %v3980_v59 = vcombine.high %v3306_v45, %v3313_v37 }
 0x7a2   : > { %v3358_v29 = vcombine.low %v3341_v51, %v3349_v52  ;;  %v3357_v34 = vrot.slane %v3350_v53, %v5517_v3 }
 0x7a3   : > { %v3391_v46 = vrot.slane %v3384_v58, %v5513_v60  ;;  %v3399_v32 = vrot.slane %v3980_v59, %v5513_v60  ;;  %v3400_v57 = vcombine.low %v3375_v14, %v3383_v55 }
 0x7a4   : > { %v3365_v61 = vrot.slane %v3358_v29, %v5517_v3 }
 0x7a5   : > { %v3408_v47 = vcombine.low %v3391_v46, %v3399_v32  ;;  %v3407_v56 = vrot.slane %v3400_v57, %v5517_v3 }
 0x7a6   : > { %v3366_v39 = vcombine.low %v3357_v34, %v3365_v61  ;;  %v3367_v4 = vcombine.high %v3357_v34, %v3365_v61 }
 0x7a7   : > { %v3415_v2 = vrot.slane %v3408_v47, %v5517_v3 }
 0x7a8   : > { %v3421_v40 = vshrl.u32 %v3366_v39, 16  ;;  %v3427_v30 = vshrl.u32 %v3367_v4, 16 }
 0x7a9   : > { %v3417_v25 = vcombine.high %v3407_v56, %v3415_v2  ;;  %v3416_v27 = vcombine.low %v3407_v56, %v3415_v2 }
 0x7ab   : > { %v3426_v54 = vpack.i.b16 %v3417_v25, %v3367_v4  ;;  %v3422_v5 = vshrl.u32 %v3416_v27, 16  ;;  %v3420_v62 = vpack.i.b16 %v3416_v27, %v3366_v39  ;;  %v3428_v48 = vshrl.u32 %v3417_v25, 16 }
 0x7ad   : > { %3432 = vrot.lane.b32.xlu0 %v3426_v54, %s4781_s26  ;;  %v3423_v60 = vpack.i.b16 %v3422_v5, %v3421_v40  ;;  %v3429_v6 = vpack.i.b16 %v3428_v48, %v3427_v30 }
 0x7af   : > { %3430 = vrot.lane.b32.xlu1 %v3423_v60, %s4779_s3 }
 0x7b3   : > { %3434 = vrot.lane.b32.xlu1 %v3429_v6, %s4782_s30 }
 0x81f   : > { %v3433_v8 = vpop.permute.xlu0 %3432 }
 0x821   : > { %v3431_v3 = vpop.permute.xlu1 %3430 }
 0x822   : > { %v3438_v7 = vsel %vm2445_vm8, %v3420_v62, %v3431_v3 }
 0x823   : > { %v3440_v9 = vsel %vm2619_vm7, %v3438_v7, %v3433_v8 }
 0x825   : > { %v3435_v1 = vpop.permute.xlu1 %3434 }
 0x826   : > { %v3443_v10 = vsel %vm3441_vm10, %v3440_v9, %v3435_v1 }
 0x827   : > { %4153 = vmatmul.mubr.msk.bf16.vlgmr.msra.gmra.mxu0 %vm1950_vm6, %v3443_v10 }
 0x8e7   : > { %v3503_v41 = vpop.f32.mrf.mxu0 }
 0x8e8   : > { %v3504_v12 = vadd.f32 %v3981_v11, %v3503_v41 }
 0x8e9   : > { %v4154_v15 = vpop.f32.mrf.mxu0 }
 0x8ea   : > { %3510 = vst.msk [vmem:[%s5188_s7] sm:$0xff] %vm1950_vm6, %v3504_v12 }
 0x8eb   : > { %v3506_v26 = vpop.f32.mrf.mxu0 }
 0x8ec   : > { %v3507_v28 = vadd.f32 %v3981_v11, %v3506_v26 }
 0x8ed   : > { %v4155_v43 = vpop.f32.mrf.mxu0 }
 0x8ee   : > { %3511 = vst.msk [vmem:[%s5188_s7 + $0x8] sm:$0xff] %vm1950_vm6, %v3507_v28 }
 0x8ef   : > { %4627 = shalt.err (!%p4624_p0)
}
 0x8f0   : > { %s4628_s7 = scalar_lea.hbm %s5740_s19, 256  ;;  %s4632_s18 = scalar_lea.hbm %s5944_s5, 1024 }
 0x8f1   : > { %p4629_p5 = scmp.ne.s32.totalorder %s5740_s19, %s4628_s7  ;;  %p4633_p11 = scmp.lt.s32.totalorder %s5740_s19, %s5944_s5 }
 0x8f2   : > { %p4634_p7 = scmp.lt.s32.totalorder %s4632_s18, %s4628_s7 }
 0x8f3   : > { %p4630_p2 = pnand %p4629_p5, %p5065_p13 }
 0x8f4   : > { %p4635_p8 = por %p4634_p7, %p4633_p11 }
 0x8f5   : > { %p4631_p3 = pneg %p4630_p2 }
 0x8f7   : > { %p4636_p10 = pnand %p4635_p8, %p4631_p3 }
 0x8f9   : > { %4639 = shalt.err (!%p4636_p10)
}
 0x8fa   : > { %s4784_s1 = smov 128   ;;  %3541 = sbr.rel (!%p5065_p13) target bundleno = 2312 (0x908), region = 120  ;;  %v3563_v16 = vld [vmem:[%s5190_s23] sm:$0xff] (%p5065_p13)   ;;  %v3567_v49 = vld [vmem:[%s5190_s23 + $0x8] sm:$0xff] (%p5065_p13)   ;;  %v3571_v13 = vld [vmem:[%s5190_s23 + $0x10] sm:$0xff] (%p5065_p13)  }
 0x8fb   : > { %4182 = dma.vmem_to_hbm [thread:$0]  (%p5065_p13), %s5742_s2, 256, %s5740_s19, %s3513_s29, %s4784_s1, %s4784_s1, %s4779_s3  }
 0x8fc   : > { %s5945_s27 = sld [smem:[#allocation30_spill]] (%p5065_p13)  ;;  %v3575_v42 = vld [vmem:[%s5190_s23 + $0x18] sm:$0xff] (%p5065_p13)  }
 0x8fd   : > { %s5946_s17 = sld [smem:[#allocation55_spill]] (%p5065_p13) }
 0x902   : > { %s3991_s0 = sshll.u32 %s5945_s27, 4 }
 0x903   : > { %s3544_s24 = sadd.s32 %s3991_s0, %s5169_s13 }
 0x904   : > { %s3992_s6 = sshll.u32 %s3544_s24, 2 }
 0x905   : > { %s3546_s3 = scalar_lea.vmem %s5946_s17, %s3992_s6 }
 0x906   : > { %3564 = vst [vmem:[%s3546_s3] sm:$0xff] %v3563_v16   ;;  %3568 = vst [vmem:[%s3546_s3 + $0x10] sm:$0xff] %v3567_v49  }
 0x907   : > { %3572 = vst [vmem:[%s3546_s3 + $0x20] sm:$0xff] %v3571_v13   ;;  %3576 = vst [vmem:[%s3546_s3 + $0x30] sm:$0xff] %v3575_v42  }
 0x908 PF: > { %s5947_s15 = sld [smem:[#allocation27_spill]]  ;;  %p4225_p13 = scmp.ge.s32.totalorder %s4750_s28, 2 }
 0x909   : > { %s5948_s2 = sld [smem:[#allocation38_spill]] }
 0x90e   : > { %s3624_s19 = sand.u32 1, %s5947_s15  }
 0x90f   : > { %p5949_p12 = scmp.ne.s32.totalorder %s5948_s2, 0  ;;  %s3625_s23 = scalar_lea.sflag [#allocation6], %s3624_s19 }
 0x911   : > { %p4211_p4 = pnand %p4225_p13, %p5949_p12 }
 0x913   : > { %p4212_p6 = pneg %p4211_p4 }
 0x915   : > { %4705 = dma.done.wait (%p4212_p6), %s3625_s23, 256  }
 0x916   : > { %4707 = vsyncadd (%p4212_p6), %s3625_s23, 4294967040  ;;  %s38_s28 = sadd.s32 1, %s4750_s28   ;;  %s5950_s18 = sld [smem:[#allocation26_spill]] }
 0x917   : > { %p35_p1 = scmp.ge.s32.totalorder %s38_s28, 6   ;;  %s5951_s13 = sld [smem:[#allocation28_spill]] }
 0x918   : > { %s5952_s23 = sld [smem:[#allocation39_spill]]  ;;  %s5957_s19 = smov %s4718_s20 }
 0x919   : > { %s5953_s24 = sld [smem:[#allocation31_spill]]  ;;  %s5958_s20 = smov %s5079_s11 }
 0x91a   : > { %s5954_s25 = sld [smem:[#allocation32_spill]]  ;;  %s5959_s21 = smov %s4726_s22 }
 0x91b   : > { %s5955_s26 = sld [smem:[#allocation35_spill]]  ;;  %37 = sbr.rel (!%p35_p1) target bundleno = 31 (0x1f), region = 235 }
 0x91c   : > { %s5956_s27 = sld [smem:[#allocation36_spill]] }
 0x91d   : > { %s5960_s22 = smov %s5951_s13 }
 0x920   :  { %3637 = vsyncpa [#allocation5], 1 }
 0x921   :  { %3639 = vsyncpa [#allocation5 + $0x1], 1 }
 0x922   :  { %3640 = vsyncpa [#allocation8], 1 }
 0x923   :  { %3642 = vsyncpa [#allocation8 + $0x1], 1 }
 0x924   :  { %3643 = vsyncpa [#allocation11], 1 }
 0x925   :  { %3644 = vsyncpa [#allocation14], 1 }
 0x926   :  { %3645 = vsyncpa [#allocation17], 1 }
 0x927   :  { %3646 = vsyncpa [#allocation6], 1 }
 0x928   :  { %3648 = vsyncpa [#allocation6 + $0x1], 1 }

</bundles_post_ra>
